<compile_context>
chip_gen: v7x
topology: tpu7x:2x2x1
jax: 0.10.0
libtpu: 0.0.40
codegen_flags: <defaults>
</compile_context>

<pallas_src>
import jax
import jax.numpy as jnp
from jax.experimental import pallas as pl
from jax.experimental.pallas import tpu as pltpu


def _attention_kernel(x_ref, w1_ref, b1_ref, w2_ref, out_ref):
    # x_ref:   [GB*N, S*D]  lane-dense rows, f32
    # w1_ref:  [S*D, H]     (mean-over-span + 1/S already folded in)
    # b1_ref:  [1, H]
    # w2_ref:  [1, H]       (second Linear weight as a lane-dense row)
    # out_ref: [GB, S*D]
    GB, SD = out_ref.shape
    N = x_ref.shape[0] // GB

    x2 = x_ref[...]                                                    # [GB*N, SD]

    # Fused (mean over span + Linear(D,128)) as one MXU matmul with a GB*N-row LHS, then ReLU.
    h = jnp.dot(x2, w1_ref[...], preferred_element_type=jnp.float32) + b1_ref[...]
    h = jnp.maximum(h, 0.0)                                            # [GB*N, H]
    # Dropout is identity in eval mode; b2 dropped (cancels in the softmax over N).

    # Linear(128, 1) as a lane-wise dot with the [1, H] weight row.
    logits = jnp.sum(h * w2_ref[...], axis=-1, keepdims=True)          # [GB*N, 1]

    # Per-group softmax over the N members (axis 1 after the free leading-dim split).
    lg = logits.reshape(GB, N, 1)
    m = jnp.max(lg, axis=1, keepdims=True)
    e = jnp.exp(lg - m)
    denom = jnp.sum(e, axis=1, keepdims=True)
    w = e / denom                                                      # exact; sums to 1

    # Weighted sum over N on the lane-dense view -> [GB, SD] unmasked lane-dense stores.
    x3 = x2.reshape(GB, N, SD)
    out_ref[...] = jnp.sum(w * x3, axis=1).astype(out_ref.dtype)


def prepare_params(w1, b1, w2, b2, n_span):
    """One-time weight preprocessing (hoisted out of the per-call path).

    * Folds mean-over-span into Linear1:  mean_s(x) @ W1  ==  x2d @ (tile(W1, S) / S),
      valid because x.reshape(..., S*D) is span-major / dim-minor.
    * W2 stored as a lane-dense [1, H] row.
    * b2 is dropped entirely: a scalar added to every logit cancels in the softmax over N.
    """
    del b2
    w1_eff = jnp.tile(w1, (n_span, 1)) * (1.0 / n_span)   # [S*D, H]
    w2_row = w2.reshape(1, -1)                            # [1, H]
    return w1_eff, b1, w2_row


def attention_module(x, params, *, groups_per_block=32):
    """Forward pass.

    x: [N, S, D]       -> returns [1, S, D]       (matches the PyTorch module), or
    x: [G, N, S, D]    -> returns [G, 1, S, D]    (G independent groups, batched per call).
    """
    w1_eff, b1, w2_row = params
    single = (x.ndim == 3)
    if single:
        x = x[None]
    G, N, S, D = x.shape
    SD = S * D
    H = w1_eff.shape[1]
    assert w1_eff.shape[0] == SD, "w1_eff must be prepared with matching n_span"

    # Groups per grid step (divisor of G).  GB*N rows per MXU push; 32*8=256 fills v6e/v7x.
    GB = min(groups_per_block, G)
    while G % GB != 0:
        GB -= 1

    x2d = x.reshape(G * N, SD)   # lane-dense, span-major / dim-minor (required by the W1 fold)

    out2d = pl.pallas_call(
        _attention_kernel,
        out_shape=jax.ShapeDtypeStruct((G, SD), x.dtype),
        grid=(G // GB,),
        in_specs=[
            pl.BlockSpec((GB * N, SD), lambda g: (g, 0)),
            pl.BlockSpec((SD, H), lambda g: (0, 0)),   # constant index: stays VMEM-resident
            pl.BlockSpec((1, H), lambda g: (0, 0)),
            pl.BlockSpec((1, H), lambda g: (0, 0)),
        ],
        out_specs=pl.BlockSpec((GB, SD), lambda g: (g, 0)),
        compiler_params=pltpu.CompilerParams(
            dimension_semantics=("parallel",)),        # v7x: shard grid over both TCs
    )(x2d, w1_eff, b1, w2_row)

    out = out2d.reshape(G, 1, S, D)
    return out[0] if single else out


def _reference(xg, w1, b1, w2, b2):
    """Pure-JAX reference for a single group [N, S, D], mirroring the PyTorch forward."""
    x_avg = jnp.mean(xg, axis=1)
    h = jnp.maximum(x_avg @ w1 + b1, 0.0)
    logits = h @ w2 + b2
    wts = jax.nn.softmax(logits, axis=0)
    return jnp.sum(wts[:, :, None] * xg, axis=0, keepdims=True)


if __name__ == "__main__":
    # Small shapes consistent with the module: embedding_dim D=32, n_span S=4 (S*D = 128,
    # exactly one vreg row), N=8 members per group, hidden H=128, G=64 batched groups.
    G, N, S, D, H = 64, 8, 4, 32, 128

    key = jax.random.PRNGKey(0)
    kx, kw1, kb1, kw2, kb2 = jax.random.split(key, 5)

    x = jax.random.normal(kx, (G, N, S, D), dtype=jnp.float32)

    # PyTorch-Linear-like init: U(-1/sqrt(fan_in), 1/sqrt(fan_in)).
    bound1 = 1.0 / (D ** 0.5)
    w1 = jax.random.uniform(kw1, (D, H), jnp.float32, -bound1, bound1)
    b1 = jax.random.uniform(kb1, (1, H), jnp.float32, -bound1, bound1)
    bound2 = 1.0 / (H ** 0.5)
    w2 = jax.random.uniform(kw2, (H, 1), jnp.float32, -bound2, bound2)
    b2 = jax.random.uniform(kb2, (1, 1), jnp.float32, -bound2, bound2)

    # One-time weight preprocessing (load-time, not per-forward).
    params = prepare_params(w1, b1, w2, b2, n_span=S)

    # Batched path: G groups per pallas_call (amortizes launch + W1 DMA, fills the MXU).
    out = jax.block_until_ready(attention_module(x, params))
    assert out.shape == (G, 1, S, D), out.shape
    ref = jax.vmap(lambda xg: _reference(xg, w1, b1, w2, b2))(x)
    assert jnp.allclose(out, ref, atol=2e-5, rtol=1e-5), "batched mismatch vs JAX reference"

    # Single-group path ([N, S, D] -> [1, S, D]) matches the PyTorch module's forward.
    out1 = jax.block_until_ready(attention_module(x[0], params))
    assert out1.shape == (1, S, D), out1.shape
    ref1 = _reference(x[0], w1, b1, w2, b2)
    assert jnp.allclose(out1, ref1, atol=2e-5, rtol=1e-5), "single-group mismatch vs reference"

    print("KERNEL_OK")
</pallas_src>

<mosaic_0001>
module attributes {stable_mosaic.version = 11 : i64} {
  func.func @_attention_kernel(%arg0: i32, %arg1: memref<256x128xf32, #tpu.memory_space<vmem>>, %arg2: memref<128x128xf32, #tpu.memory_space<vmem>>, %arg3: memref<1x128xf32, #tpu.memory_space<vmem>>, %arg4: memref<1x128xf32, #tpu.memory_space<vmem>>, %arg5: memref<32x128xf32, #tpu.memory_space<vmem>>) attributes {dimension_semantics = [#tpu.dimension_semantics<parallel>], iteration_bounds = array<i64: 2>, scalar_prefetch = 0 : i64, scratch_operands = 0 : i64, tpu.core_type = #tpu.core_type<tc>, window_params = [{transform_indices = @transform_0, window_bounds = array<i64: 256, 128>}, {pipeline_mode = #tpu.pipeline_mode<synchronous>, transform_indices = @transform_1, window_bounds = array<i64: 128, 128>}, {pipeline_mode = #tpu.pipeline_mode<synchronous>, transform_indices = @transform_2, window_bounds = array<i64: 1, 128>}, {pipeline_mode = #tpu.pipeline_mode<synchronous>, transform_indices = @transform_3, window_bounds = array<i64: 1, 128>}, {transform_indices = @transform_4, window_bounds = array<i64: 32, 128>}]} {
    %c0 = arith.constant 0 : index
    %c0_0 = arith.constant 0 : index
    %0 = vector.load %arg1[%c0, %c0_0] : memref<256x128xf32, #tpu.memory_space<vmem>>, vector<256x128xf32>
    %c0_1 = arith.constant 0 : index
    %c0_2 = arith.constant 0 : index
    %1 = vector.load %arg2[%c0_1, %c0_2] : memref<128x128xf32, #tpu.memory_space<vmem>>, vector<128x128xf32>
    %cst = arith.constant dense<0.000000e+00> : vector<256x128xf32>
    %2 = tpu.matmul %0, %1, %cst {dimension_numbers = #tpu.dot_dimension_numbers<[1], [0], [0], [1], [0, 0, 1, 1], [], []>} : vector<256x128xf32>, vector<128x128xf32>, vector<256x128xf32> -> vector<256x128xf32>
    %c0_3 = arith.constant 0 : index
    %c0_4 = arith.constant 0 : index
    %3 = vector.load %arg3[%c0_3, %c0_4] : memref<1x128xf32, #tpu.memory_space<vmem>>, vector<1x128xf32>
    %4 = vector.broadcast %3 : vector<1x128xf32> to vector<256x128xf32>
    %5 = arith.addf %2, %4 : vector<256x128xf32>
    %cst_5 = arith.constant 0.000000e+00 : f32
    %6 = vector.broadcast %cst_5 : f32 to vector<256x128xf32>
    %7 = arith.maximumf %5, %6 : vector<256x128xf32>
    %c0_6 = arith.constant 0 : index
    %c0_7 = arith.constant 0 : index
    %8 = vector.load %arg4[%c0_6, %c0_7] : memref<1x128xf32, #tpu.memory_space<vmem>>, vector<1x128xf32>
    %9 = vector.broadcast %8 : vector<1x128xf32> to vector<256x128xf32>
    %10 = arith.mulf %7, %9 : vector<256x128xf32>
    %cst_8 = arith.constant dense<0.000000e+00> : vector<256xf32>
    %11 = vector.multi_reduction <add>, %10, %cst_8 [1] : vector<256x128xf32> to vector<256xf32>
    %12 = vector.shape_cast %11 : vector<256xf32> to vector<256x1xf32>
    %13 = vector.shape_cast %12 : vector<256x1xf32> to vector<32x8x1xf32>
    %cst_9 = arith.constant dense<0xFF800000> : vector<32x1xf32>
    %14 = vector.multi_reduction <maximumf>, %13, %cst_9 [1] : vector<32x8x1xf32> to vector<32x1xf32>
    %15 = vector.shape_cast %14 : vector<32x1xf32> to vector<32x1x1xf32>
    %16 = vector.broadcast %15 : vector<32x1x1xf32> to vector<32x8x1xf32>
    %17 = arith.subf %13, %16 : vector<32x8x1xf32>
    %18 = math.exp %17 : vector<32x8x1xf32>
    %cst_10 = arith.constant dense<0.000000e+00> : vector<32x1xf32>
    %19 = vector.multi_reduction <add>, %18, %cst_10 [1] : vector<32x8x1xf32> to vector<32x1xf32>
    %20 = vector.shape_cast %19 : vector<32x1xf32> to vector<32x1x1xf32>
    %21 = vector.broadcast %20 : vector<32x1x1xf32> to vector<32x8x1xf32>
    %22 = arith.divf %18, %21 : vector<32x8x1xf32>
    %23 = vector.shape_cast %0 : vector<256x128xf32> to vector<32x8x128xf32>
    %24 = vector.broadcast %22 : vector<32x8x1xf32> to vector<32x8x128xf32>
    %25 = arith.mulf %24, %23 : vector<32x8x128xf32>
    %cst_11 = arith.constant dense<0.000000e+00> : vector<32x128xf32>
    %26 = vector.multi_reduction <add>, %25, %cst_11 [1] : vector<32x8x128xf32> to vector<32x128xf32>
    %c0_12 = arith.constant 0 : index
    %c0_13 = arith.constant 0 : index
    %27 = vector.load %arg5[%c0_12, %c0_13] : memref<32x128xf32, #tpu.memory_space<vmem>>, vector<32x128xf32>
    tpu.vector_store %arg5[%c0_12, %c0_13], %26 {strides = array<i32>} : memref<32x128xf32, #tpu.memory_space<vmem>>, vector<32x128xf32>,
    return
  }
  func.func @transform_0(%arg0: i32) -> (i32, i32) {
    %c0_i32 = arith.constant 0 : i32
    %c0_i32_0 = arith.constant 0 : i32
    return %arg0, %c0_i32 : i32, i32
  }
  func.func @transform_1(%arg0: i32) -> (i32, i32) {
    %c0_i32 = arith.constant 0 : i32
    %c0_i32_0 = arith.constant 0 : i32
    %c0_i32_1 = arith.constant 0 : i32
    return %c0_i32, %c0_i32_0 : i32, i32
  }
  func.func @transform_2(%arg0: i32) -> (i32, i32) {
    %c0_i32 = arith.constant 0 : i32
    %c0_i32_0 = arith.constant 0 : i32
    %c0_i32_1 = arith.constant 0 : i32
    return %c0_i32, %c0_i32_0 : i32, i32
  }
  func.func @transform_3(%arg0: i32) -> (i32, i32) {
    %c0_i32 = arith.constant 0 : i32
    %c0_i32_0 = arith.constant 0 : i32
    %c0_i32_1 = arith.constant 0 : i32
    return %c0_i32, %c0_i32_0 : i32, i32
  }
  func.func @transform_4(%arg0: i32) -> (i32, i32) {
    %c0_i32 = arith.constant 0 : i32
    %c0_i32_0 = arith.constant 0 : i32
    return %arg0, %c0_i32 : i32, i32
  }
}

</mosaic_0001>

<bundles_post_ra>
// kernel: tpu_custom_call.1
= control target key start
LH: loop header
LB: loop body
LE: loop exit
PB: predicated region body
PF: predicated region fallthrough
CT: control target
= control target key end

     0   :  { %9 = vsyncpa [#allocation3], 0  ;;  %s3002_s0 = inlined_call_operand.hbm [shape: f32[512,128], index: 0, kind: input, shape index: {}]   ;;  %s3003_s1 = inlined_call_operand.hbm [shape: f32[128,128], index: 1, kind: input, shape index: {}]   ;;  %s3004_s2 = inlined_call_operand.vmem [shape: f32[1,128], index: 2, kind: input, shape index: {}]   ;;  %s3005_s3 = inlined_call_operand.vmem [shape: f32[1,128], index: 3, kind: input, shape index: {}]   ;;  %s3006_s4 = inlined_call_operand.hbm [shape: f32[64,128], index: 4, kind: output, shape index: {}]  }
   0x1   :  { %11 = vsyncpa [#allocation3 + $0x1], 0 }
   0x2   :  { %12 = vsyncpa [#allocation6], 0 }
   0x3   :  { %13 = vsyncpa [#allocation4], 0 }
   0x4   :  { %15 = vsyncpa [#allocation4 + $0x1], 0  ;;  %s2160_s15 = smov 0   ;;  %s2162_s16 = smov 0  }
   0x5   :  { %s2164_s17 = smov 0   ;;  %s2166_s18 = smov 0  }
   0x6 LB: > { %s2181_s19 = sadd.s32 4294967295, %s2126_s18   ;;  %s1588_s20 = sadd.s32 4294967294, %s2126_s18   ;;  %s2126_s18 = sphi %s2166_s18, %s3026_s18   ;;  %s2122_s17 = sphi %s2164_s17, %s3025_s17   ;;  %s2118_s16 = sphi %s2162_s16, %s3024_s16   ;;  %s2114_s15 = sphi %s2160_s15, %s3023_s15  }
   0x7   : > { %p41_p0 = scmp.ne.s32.totalorder %s2118_s16, %s2114_s15  ;;  %p3007_p1 = scmp.eq.s32.totalorder %s2181_s19, 0 }
   0x8   : > { %p134_p3 = scmp.eq.s32.totalorder %s1588_s20, 1  ;;  %p1589_p5 = scmp.ge.s32.totalorder %s2126_s18, 1 }
   0x9   : > { %p2190_p4 = por %p3007_p1, %p41_p0  ;;  %p141_p7 = scmp.lt.s32.totalorder %s2126_s18, 3 }
   0xa   : > { %p2195_p6 = por %p134_p3, %p41_p0  ;;  %s2128_s24 = smov [#allocation5]  }
   0xb   : > { %s3010_s21 = scalar_select %p2190_p4, 1, 0 }
   0xc   : > { %s3011_s22 = scalar_select %p2195_p6, 1, 0 }
   0xd   : > { %p2200_p8 = pnand %p1589_p5, %p141_p7  ;;  %s153_s25 = sshll.u32 %s2128_s24, 4  ;;  %s2204_s25 = int_to_ptr.vmem [resolvable:$true] %s153_s25 }
   0xe   : > { %s2216_s27 = sadd.s32 1, %s2126_s18   ;;  %s28_s28 = sadd.s32 1, %s2122_s17 }
   0xf   : > { %s3012_s23 = scalar_select %p2200_p8, 1, 0 }
  0x10   : > { %p1792_p9 = pneg %p2200_p8  ;;  %s25_s29 = ssub.s32 %s2126_s18, %s2216_s27 }
  0x11   : > { %s1998_s6 = scalar_lea.hbm %s3003_s1, 2048 }
  0x12   : > { %p2211_p11 = pnand %p1792_p9, %p3007_p1  ;;  %p1999_p12 = scmp.ne.s32.totalorder %s3003_s1, %s1998_s6 }
  0x13   : > { %p2005_p5 = scmp.lt.u32.totalorder %s1998_s6, %s3003_s1 }
  0x14   : > { %p2000_p13 = pneg %p2211_p11 }
  0x16   : > { %p2001_p0 = pnand %p2000_p13, %p1999_p12 }
  0x18   : > { %p2002_p3 = pneg %p2001_p0 }
  0x1a   : > { %p2007_p7 = pnand %p2005_p5, %p2002_p3 }
  0x1c   : > { %2010 = shalt.err (!%p2007_p7)
}
  0x1d   : > { %s2011_s11 = scalar_lea.vmem %s2204_s25, 2048  ;;  %p2019_p2 = scmp.lt.s32.totalorder %s2204_s25, %s2204_s25 }
  0x1e   : > { %p2012_p9 = scmp.ne.s32.totalorder %s2204_s25, %s2011_s11  ;;  %p2020_p6 = scmp.lt.s32.totalorder %s2011_s11, %s2011_s11 }
  0x20   : > { %p2014_p10 = pnand %p2012_p9, %p2000_p13  ;;  %p2021_p4 = por %p2020_p6, %p2019_p2 }
  0x22   : > { %p2015_p1 = pneg %p2014_p10 }
  0x24   : > { %p2022_p8 = pnand %p2021_p4, %p2015_p1 }
  0x26   : > { %2025 = shalt.err (!%p2022_p8)
}
  0x27   : > { %s2129_s12 = smov 128   ;;  %s2130_s13 = smov 8  }
  0x28   : > { %1795 = dma.hbm_to_vmem [thread:$0]  (!%p2211_p11), %s3003_s1, 2048, %s2204_s25, [#allocation6], %s2129_s12, %s2129_s12, %s2130_s13  }
  0x29   : > { %p26_p1 = scmp.eq.s32.totalorder %s25_s29, 0  ;;  %p35_p2 = scmp.ne.s32.totalorder %s2122_s17, %s2118_s16 }
  0x2a   : > { %p36_p4 = scmp.eq.s32.totalorder %s2126_s18, 0  ;;  %p1805_p6 = scmp.lt.s32.totalorder %s2126_s18, 2 }
  0x2b   : > { %s2250_s24 = scalar_select %p26_p1, %s2122_s17, %s28_s28  }
  0x2c   : > { %p37_p8 = por %p36_p4, %p35_p2  ;;  %p3014_p10 = scmp.eq.s32.totalorder %s2181_s19, 1 }
  0x2d   : > { %s173_s26 = sand.u32 1, %s2122_s17   ;;  %s1606_s5 = sshll.u32 %s2126_s18, 12 }
  0x2e   : > { %p2254_p12 = por %p3014_p10, %p35_p2  ;;  %s1592_s6 = sshll.u32 %s173_s26, 8 }
  0x2f   : > { %s2263_s9 = scalar_lea.hbm %s3002_s0, %s1606_s5  ;;  %s177_s25 = scalar_lea.vmem [#allocation2], %s1592_s6 }
  0x30   : > { %s184_s28 = sshll.u32 %s177_s25, 4  ;;  %p2265_p11 = pnand %p1805_p6, %p37_p8  ;;  %s2269_s28 = int_to_ptr.vmem [resolvable:$true] %s184_s28 }
  0x31   : > { %s2271_s10 = scalar_lea.sflag [#allocation3], %s173_s26  ;;  %s2026_s11 = scalar_lea.hbm %s2263_s9, 4096 }
  0x32   : > { %p2027_p13 = scmp.ne.s32.totalorder %s2263_s9, %s2026_s11  ;;  %p2028_p0 = pneg %p2265_p11 }
  0x33   : > { %s2031_s5 = scalar_lea.hbm %s3002_s0, 8192  ;;  %p2032_p7 = scmp.lt.u32.totalorder %s2263_s9, %s3002_s0 }
  0x34   : > { %p2029_p3 = pnand %p2028_p0, %p2027_p13  ;;  %p2033_p9 = scmp.lt.u32.totalorder %s2031_s5, %s2026_s11 }
  0x35   : > { %p2035_p2 = scmp.lt.u32.totalorder %s2026_s11, %s2263_s9 }
  0x36   : > { %p2030_p5 = pneg %p2029_p3  ;;  %p2034_p1 = por %p2033_p9, %p2032_p7 }
  0x38   : > { %p2036_p4 = por %p2035_p2, %p2034_p1 }
  0x3a   : > { %p2037_p6 = pnand %p2036_p4, %p2030_p5 }
  0x3c   : > { %2040 = shalt.err (!%p2037_p6)
}
  0x3d   : > { %s2041_s26 = scalar_lea.vmem %s2269_s28, 4096  ;;  %s2131_s8 = smov [#allocation2]  }
  0x3e   : > { %p2042_p8 = scmp.ne.s32.totalorder %s2269_s28, %s2041_s26  ;;  %s2046_s25 = sshll.u32 %s2131_s8, 4  ;;  %s2047_s25 = int_to_ptr.vmem [resolvable:$false] %s2046_s25 }
  0x3f   : > { %s2048_s14 = scalar_lea.vmem %s2047_s25, 8192  ;;  %p2049_p3 = scmp.lt.s32.totalorder %s2269_s28, %s2047_s25 }
  0x40   : > { %p2044_p10 = pnand %p2042_p8, %p2028_p0  ;;  %p2050_p7 = scmp.lt.s32.totalorder %s2048_s14, %s2041_s26 }
  0x42   : > { %p2045_p13 = pneg %p2044_p10  ;;  %p2051_p9 = por %p2050_p7, %p2049_p3 }
  0x44   : > { %p2052_p1 = pnand %p2051_p9, %p2045_p13 }
  0x46   : > { %2055 = shalt.err (!%p2052_p1)
}
  0x47   : > { %1799 = dma.hbm_to_vmem [thread:$0]  (!%p2265_p11), %s2263_s9, 4096, %s2269_s28, %s2271_s10, %s2129_s12, %s2129_s12, %s2130_s13  }
  0x48   : > { %p3017_p0 = scmp.ne.s32.totalorder %s3012_s23, 0 }
  0x49   : > { %s2305_s11 = sand.u32 (!%p3017_p0), 1, %s2118_s16   ;;  %p3018_p5 = scmp.ne.s32.totalorder (!%p3017_p0), %s3010_s21, 0 }
  0x4a   : > { %196 = sbr.rel (%p3017_p0) target bundleno = 714 (0x2ca), region = 36  ;;  %s1596_s20 = sshll.u32 (!%p3017_p0), %s2305_s11, 8 }
  0x4b   : > { %s199_s5 = scalar_lea.sflag (!%p3017_p0), [#allocation3], %s2305_s11  ;;  %s2309_s6 = scalar_lea.vmem (!%p3017_p0), [#allocation2], %s1596_s20 }
  0x51   : > { %2101 = dma.done.wait (%p3018_p5), %s199_s5, 4096  }
  0x52   : > { %2103 = vsyncadd (%p3018_p5), %s199_s5, 4294963200  ;;  %p3019_p11 = scmp.eq.s32.totalorder %s2181_s19, 0 }
  0x54   : > { %2105 = dma.done.wait (%p3019_p11), [#allocation6], 2048   ;;  %p3020_p2 = pmov %p3019_p11 }
  0x55   : > { %v265_v0 = vld [vmem:[#allocation5] sm:$0xff]  ;;  %v266_v1 = vld [vmem:[#allocation5 + $0x8] sm:$0xff]  ;;  %v267_v2 = vld [vmem:[#allocation5 + $0x10] sm:$0xff]  ;;  %vm1448_vm0 = vcmask 1041409   ;;  %vm1450_vm1 = vcmask 1042434   ;;  %vm1452_vm2 = vcmask 1043459  }
  0x56   : > { %2107 = vsyncadd (%p3020_p2), [#allocation6], 4294965248  ;;  %v1736_v3 = vpack.c.bf16 %v266_v1, %v265_v0  ;;  %v268_v4 = vld [vmem:[#allocation5 + $0x18] sm:$0xff]  ;;  %v269_v6 = vld [vmem:[#allocation5 + $0x20] sm:$0xff]  ;;  %vm1454_vm3 = vcmask 1044484   ;;  %s1598_s9 = sshll.u32 %s2305_s11, 5 }
  0x57   : > { %v1740_v5 = vpack.c.bf16 %v268_v4, %v267_v2  ;;  %v270_v7 = vld [vmem:[#allocation5 + $0x28] sm:$0xff]  ;;  %v2320_v9 = vld [vmem:[%s2309_s6] sm:$0xff]  ;;  %v271_v11 = vld [vmem:[#allocation5 + $0x30] sm:$0xff]  ;;  %vm1456_vm4 = vcmask 1045509   ;;  %vm1458_vm5 = vcmask 1046534   ;;  %vm1460_vm6 = vcmask 1047559  }
  0x58   : > { %1737 = vmatprep.subr.bf16.mxu0 %v1736_v3  ;;  %1768 = vmatprep.subr.bf16.mxu1 %v1736_v3  ;;  %v1744_v8 = vpack.c.bf16 %v270_v7, %v269_v6  ;;  %v2323_v10 = vld [vmem:[%s2309_s6 + $0x80] sm:$0xff]  ;;  %v272_v12 = vld [vmem:[#allocation5 + $0x38] sm:$0xff]  ;;  %v274_v15 = vld [vmem:[#allocation5 + $0x48] sm:$0xff]  ;;  %s2908_s28 = scalar_lea.vmem [#allocation7], %s1598_s9  ;;  %s1607_s29 = sshll.u32 %s2181_s19, 9 }
  0x59   : > { %1739 = vmatpush3.bf16.msra.mxu0 %v1736_v3  ;;  %1776 = vmatpush3.bf16.msra.mxu1 %v1736_v3  ;;  %v1748_v13 = vpack.c.bf16 %v272_v12, %v271_v11  ;;  %v273_v14 = vld [vmem:[#allocation5 + $0x40] sm:$0xff]  ;;  %v275_v17 = vld [vmem:[#allocation5 + $0x50] sm:$0xff]  ;;  %v276_v18 = vld [vmem:[#allocation5 + $0x58] sm:$0xff]  ;;  %s1505_s10 = sshll.u32 %s2908_s28, 4  ;;  %s2953_s8 = scalar_lea.hbm %s3006_s4, %s1607_s29  ;;  %s2955_s10 = int_to_ptr.vmem [resolvable:$true] %s1505_s10 }
  0x5a   : > { %1741 = vmatprep.subr.bf16.mxu0 %v1740_v5  ;;  %1769 = vmatprep.subr.bf16.mxu1 %v1740_v5  ;;  %v1752_v16 = vpack.c.bf16 %v274_v15, %v273_v14  ;;  %v1756_v19 = vpack.c.bf16 %v276_v18, %v275_v17  ;;  %v277_v20 = vld [vmem:[#allocation5 + $0x60] sm:$0xff]  ;;  %v278_v21 = vld [vmem:[#allocation5 + $0x68] sm:$0xff]  ;;  %v279_v23 = vld [vmem:[#allocation5 + $0x70] sm:$0xff]  ;;  %s1492_s19 = scalar_lea.sflag [#allocation4], %s2305_s11  ;;  %s2056_s25 = scalar_lea.vmem %s2955_s10, 512 }
  0x5b   : > { %1688 = vmatprep.mubr.f32.mxu0 %v2320_v9  ;;  %1712 = vmatprep.mubr.f32.mxu1 %v2323_v10  ;;  %v1760_v22 = vpack.c.bf16 %v278_v21, %v277_v20  ;;  %v280_v24 = vld [vmem:[#allocation5 + $0x78] sm:$0xff]  ;;  %v2328_v26 = vld [vmem:[%s2309_s6 + $0x8] sm:$0xff]  ;;  %v235_v28 = vld [vmem:[%s2309_s6 + $0x10] sm:$0xff]  ;;  %p2057_p4 = scmp.ne.s32.totalorder %s2955_s10, %s2056_s25  ;;  %s2132_s14 = smov [#allocation7]  }
  0x5c   : > { %v1764_v25 = vpack.c.bf16 %v280_v24, %v279_v23  ;;  %v2331_v27 = vld [vmem:[%s2309_s6 + $0x88] sm:$0xff]  ;;  %v251_v29 = vld [vmem:[%s2309_s6 + $0x90] sm:$0xff]  ;;  %v2338_v30 = vld [vmem:[%s2309_s6 + $0x18] sm:$0xff]  ;;  %s2060_s20 = sshll.u32 %s2132_s14, 4  ;;  %s2061_s20 = int_to_ptr.vmem [resolvable:$false] %s2060_s20 }
  0x5d   : > { %1743 = vmatpush3.bf16.msra.mxu0 %v1740_v5  ;;  %1777 = vmatpush3.bf16.msra.mxu1 %v1740_v5  ;;  %v2341_v31 = vld [vmem:[%s2309_s6 + $0x98] sm:$0xff]  ;;  %v237_v32 = vld [vmem:[%s2309_s6 + $0x20] sm:$0xff]  ;;  %v238_v34 = vld [vmem:[%s2309_s6 + $0x28] sm:$0xff]  ;;  %p2058_p6 = pnand %p2057_p4, %p2254_p12  ;;  %s2062_s5 = scalar_lea.vmem %s2061_s20, 1024 }
  0x5e   : > { %1745 = vmatprep.subr.bf16.mxu0 %v1744_v8  ;;  %1770 = vmatprep.subr.bf16.mxu1 %v1744_v8  ;;  %v253_v33 = vld [vmem:[%s2309_s6 + $0xa0] sm:$0xff]  ;;  %v254_v35 = vld [vmem:[%s2309_s6 + $0xa8] sm:$0xff]  ;;  %v239_v36 = vld [vmem:[%s2309_s6 + $0x30] sm:$0xff]  ;;  %p2063_p10 = scmp.lt.s32.totalorder %s2955_s10, %s2061_s20  ;;  %p2064_p13 = scmp.lt.s32.totalorder %s2062_s5, %s2056_s25 }
  0x5f   : > { %v255_v37 = vld [vmem:[%s2309_s6 + $0xb0] sm:$0xff]  ;;  %v240_v38 = vld [vmem:[%s2309_s6 + $0x38] sm:$0xff]  ;;  %v241_v40 = vld [vmem:[%s2309_s6 + $0x40] sm:$0xff]  ;;  %p2059_p8 = pneg %p2058_p6 }
  0x60   : > { %v256_v39 = vld [vmem:[%s2309_s6 + $0xb8] sm:$0xff]  ;;  %v257_v41 = vld [vmem:[%s2309_s6 + $0xc0] sm:$0xff]  ;;  %v2356_v42 = vld [vmem:[%s2309_s6 + $0x48] sm:$0xff]  ;;  %p2065_p3 = por %p2064_p13, %p2063_p10 }
  0x61   : > { %1747 = vmatpush3.bf16.msra.mxu0 %v1744_v8  ;;  %1778 = vmatpush3.bf16.msra.mxu1 %v1744_v8  ;;  %v258_v43 = vld [vmem:[%s2309_s6 + $0xc8] sm:$0xff]  ;;  %v243_v44 = vld [vmem:[%s2309_s6 + $0x50] sm:$0xff]  ;;  %v244_v46 = vld [vmem:[%s2309_s6 + $0x58] sm:$0xff] }
  0x62   : > { %1749 = vmatprep.subr.bf16.mxu0 %v1748_v13  ;;  %1771 = vmatprep.subr.bf16.mxu1 %v1748_v13  ;;  %v259_v45 = vld [vmem:[%s2309_s6 + $0xd0] sm:$0xff]  ;;  %v260_v47 = vld [vmem:[%s2309_s6 + $0xd8] sm:$0xff]  ;;  %v245_v48 = vld [vmem:[%s2309_s6 + $0x60] sm:$0xff]  ;;  %p2066_p7 = pnand %p2065_p3, %p2059_p8 }
  0x63   : > { %v261_v49 = vld [vmem:[%s2309_s6 + $0xe0] sm:$0xff]  ;;  %v246_v50 = vld [vmem:[%s2309_s6 + $0x68] sm:$0xff]  ;;  %v247_v52 = vld [vmem:[%s2309_s6 + $0x70] sm:$0xff] }
  0x64   : > { %v262_v51 = vld [vmem:[%s2309_s6 + $0xe8] sm:$0xff]  ;;  %v263_v53 = vld [vmem:[%s2309_s6 + $0xf0] sm:$0xff]  ;;  %v248_v54 = vld [vmem:[%s2309_s6 + $0x78] sm:$0xff] }
  0x65   : > { %1751 = vmatpush3.bf16.msra.mxu0 %v1748_v13  ;;  %1779 = vmatpush3.bf16.msra.mxu1 %v1748_v13  ;;  %v264_v55 = vld [vmem:[%s2309_s6 + $0xf8] sm:$0xff]  ;;  %v2375_v56 = vld [vmem:[%s3004_s2] ss:$0 sm:$0xff] }
  0x66   : > { %1753 = vmatprep.subr.bf16.mxu0 %v1752_v16  ;;  %1772 = vmatprep.subr.bf16.mxu1 %v1752_v16  ;;  %v2383_v0 = vld [vmem:[%s3005_s3] ss:$0 sm:$0xff] }
  0x69   : > { %1755 = vmatpush3.bf16.msra.mxu0 %v1752_v16  ;;  %1780 = vmatpush3.bf16.msra.mxu1 %v1752_v16 }
  0x6a   : > { %1757 = vmatprep.subr.bf16.mxu0 %v1756_v19  ;;  %1773 = vmatprep.subr.bf16.mxu1 %v1756_v19 }
  0x6d   : > { %1759 = vmatpush3.bf16.msra.mxu0 %v1756_v19  ;;  %1781 = vmatpush3.bf16.msra.mxu1 %v1756_v19 }
  0x6e   : > { %1761 = vmatprep.subr.bf16.mxu0 %v1760_v22  ;;  %1774 = vmatprep.subr.bf16.mxu1 %v1760_v22 }
  0x71   : > { %1763 = vmatpush3.bf16.msra.mxu0 %v1760_v22  ;;  %1782 = vmatpush3.bf16.msra.mxu1 %v1760_v22 }
  0x72   : > { %1765 = vmatprep.subr.bf16.mxu0 %v1764_v25  ;;  %1775 = vmatprep.subr.bf16.mxu1 %v1764_v25 }
  0x75   : > { %1767 = vmatpush3.bf16.msra.mxu0 %v1764_v25  ;;  %1783 = vmatpush3.bf16.msra.mxu1 %v1764_v25 }
  0x78   : > { %1689 = vmatmul.mubr.f32.vlgmr.msra.gmra.mrb[0].mxu0 %v2328_v26  ;;  %1713 = vmatmul.mubr.f32.vlgmr.msra.gmra.mrb[0].mxu1 %v2331_v27 }
  0x79   : > { %1691 = vmatprep.mubr.f32.mxu0 %v235_v28  ;;  %1715 = vmatprep.mubr.f32.mxu1 %v251_v29 }
  0x7c   : > { %1692 = vmatmul.mubr.f32.gmra.mrb[2].mxu0 %v2338_v30  ;;  %1716 = vmatmul.mubr.f32.gmra.mrb[2].mxu1 %v2341_v31 }
  0x7d   : > { %1694 = vmatprep.mubr.f32.mxu0 %v237_v32  ;;  %1718 = vmatprep.mubr.f32.mxu1 %v253_v33 }
  0x80   : > { %1695 = vmatmul.mubr.f32.gmra.mrb[4].mxu0 %v238_v34  ;;  %1719 = vmatmul.mubr.f32.gmra.mrb[4].mxu1 %v254_v35 }
  0x81   : > { %1697 = vmatprep.mubr.f32.mxu0 %v239_v36  ;;  %1721 = vmatprep.mubr.f32.mxu1 %v255_v37 }
  0x84   : > { %1698 = vmatmul.mubr.f32.gmra.mrb[6].mxu0 %v240_v38  ;;  %1722 = vmatmul.mubr.f32.gmra.mrb[6].mxu1 %v256_v39 }
  0x85   : > { %1700 = vmatprep.mubr.f32.mxu0 %v241_v40  ;;  %1724 = vmatprep.mubr.f32.mxu1 %v257_v41 }
  0x88   : > { %1701 = vmatmul.mubr.f32.gmra.mrb[8].mxu0 %v2356_v42  ;;  %1725 = vmatmul.mubr.f32.gmra.mrb[8].mxu1 %v258_v43 }
  0x89   : > { %1703 = vmatprep.mubr.f32.mxu0 %v243_v44  ;;  %1727 = vmatprep.mubr.f32.mxu1 %v259_v45 }
  0x8c   : > { %1704 = vmatmul.mubr.f32.gmra.mrb[10].mxu0 %v244_v46  ;;  %1728 = vmatmul.mubr.f32.gmra.mrb[10].mxu1 %v260_v47 }
  0x8d   : > { %1706 = vmatprep.mubr.f32.mxu0 %v245_v48  ;;  %1730 = vmatprep.mubr.f32.mxu1 %v261_v49 }
  0x90   : > { %1707 = vmatmul.mubr.f32.gmra.mrb[12].mxu0 %v246_v50  ;;  %1731 = vmatmul.mubr.f32.gmra.mrb[12].mxu1 %v262_v51 }
  0x91   : > { %1709 = vmatprep.mubr.f32.mxu0 %v247_v52  ;;  %1733 = vmatprep.mubr.f32.mxu1 %v263_v53 }
  0x94   : > { %1710 = vmatmul.mubr.f32.gmra.mrb[14].mxu0 %v248_v54  ;;  %1734 = vmatmul.mubr.f32.gmra.mrb[14].mxu1 %v264_v55 }
 0x14b   : > { %v1690_v57 = vpop.f32.mrb[0].mxu0  ;;  %v1714_v58 = vpop.f32.mrb[0].mxu1 }
 0x14c   : > { %v360_v59 = vadd.f32 %v1690_v57, %v2375_v56  ;;  %v440_v60 = vadd.f32 %v1714_v58, %v2375_v56  ;;  %v354_v61 = vpop.f32.mrb[1].mxu0  ;;  %v434_v62 = vpop.f32.mrb[1].mxu1 }
 0x14d   : > { %v355_v63 = vadd.f32 %v2375_v56, %v354_v61  ;;  %v435_v6 = vadd.f32 %v2375_v56, %v434_v62 }
 0x14e   : > { %v514_v1 = vmax.f32 %v360_v59, 0.0  ;;  %v530_v2 = vmax.f32 %v440_v60, 0.0 }
 0x14f   : > { %v1693_v3 = vpop.f32.mrb[2].mxu0  ;;  %v1717_v4 = vpop.f32.mrb[2].mxu1  ;;  %v513_v5 = vmax.f32 %v355_v63, 0.0  ;;  %v529_v16 = vmax.f32 %v435_v6, 0.0 }
 0x150   : > { %v364_v7 = vpop.f32.mrb[3].mxu0  ;;  %v569_v8 = vmul.f32 %v2383_v0, %v530_v2  ;;  %v553_v11 = vmul.f32 %v2383_v0, %v514_v1  ;;  %v444_v12 = vpop.f32.mrb[3].mxu1  ;;  %v370_v15 = vadd.f32 %v1693_v3, %v2375_v56  ;;  %v450_v23 = vadd.f32 %v1717_v4, %v2375_v56 }
 0x151   : > { %v552_v18 = vmul.f32 %v2383_v0, %v513_v5  ;;  %v568_v25 = vmul.f32 %v2383_v0, %v529_v16  ;;  %v365_v29 = vadd.f32 %v2375_v56, %v364_v7  ;;  %v445_v43 = vadd.f32 %v2375_v56, %v444_v12 }
 0x152   : > { %618 = vadd.xlane.f32.xlu1 %v569_v8  ;;  %586 = vadd.xlane.f32.xlu0 %v553_v11  ;;  %v516_v22 = vmax.f32 %v370_v15, 0.0  ;;  %v532_v34 = vmax.f32 %v450_v23, 0.0 }
 0x153   : > { %v1696_v13 = vpop.f32.mrb[4].mxu0  ;;  %v1720_v14 = vpop.f32.mrb[4].mxu1  ;;  %v515_v46 = vmax.f32 %v365_v29, 0.0  ;;  %v531_v58 = vmax.f32 %v445_v43, 0.0 }
 0x154   : > { %v2389_v17 = vpop.f32.mrb[5].mxu0  ;;  %v2392_v19 = vpop.f32.mrb[5].mxu1  ;;  %v555_v38 = vmul.f32 %v2383_v0, %v516_v22  ;;  %v571_v49 = vmul.f32 %v2383_v0, %v532_v34  ;;  %v380_v57 = vadd.f32 %v1696_v13, %v2375_v56  ;;  %v460_v2 = vadd.f32 %v1720_v14, %v2375_v56 }
 0x155   : > { %v554_v60 = vmul.f32 %v2383_v0, %v515_v46  ;;  %v570_v7 = vmul.f32 %v2383_v0, %v531_v58  ;;  %v375_v22 = vadd.f32 %v2375_v56, %v2389_v17  ;;  %v455_v17 = vadd.f32 %v2375_v56, %v2392_v19 }
 0x156   : > { %584 = vadd.xlane.f32.xlu0 %v552_v18  ;;  %v518_v5 = vmax.f32 %v380_v57, 0.0  ;;  %v534_v29 = vmax.f32 %v460_v2, 0.0 }
 0x157   : > { %v2394_v20 = vpop.f32.mrb[6].mxu0  ;;  %v2396_v21 = vpop.f32.mrb[6].mxu1 }
 0x158   : > { %v2399_v24 = vpop.f32.mrb[7].mxu0  ;;  %v2402_v28 = vpop.f32.mrb[7].mxu1  ;;  %v573_v43 = vmul.f32 %v2383_v0, %v534_v29 }
 0x159   : > { %v385_v46 = vadd.f32 %v2375_v56, %v2399_v24 }
 0x15a   : > { %616 = vadd.xlane.f32.xlu0 %v568_v25 }
 0x15b   : > { %v1702_v32 = vpop.f32.mrb[8].mxu0  ;;  %v1726_v33 = vpop.f32.mrb[8].mxu1 }
 0x15c   : > { %v400_v35 = vadd.f32 %v1702_v32, %v2375_v56  ;;  %v394_v36 = vpop.f32.mrb[9].mxu0  ;;  %v480_v37 = vadd.f32 %v1726_v33, %v2375_v56  ;;  %v2408_v39 = vpop.f32.mrb[9].mxu1  ;;  %v557_v33 = vmul.f32 %v2383_v0, %v518_v5 }
 0x15d   : > { %v395_v47 = vadd.f32 %v2375_v56, %v394_v36 }
 0x15e   : > { %v522_v40 = vmax.f32 %v400_v35, 0.0  ;;  %v538_v41 = vmax.f32 %v480_v37, 0.0  ;;  %590 = vadd.xlane.f32.xlu0 %v555_v38  ;;  %v517_v38 = vmax.f32 %v375_v22, 0.0 }
 0x15f   : > { %v1705_v44 = vpop.f32.mrb[10].mxu0  ;;  %v1729_v45 = vpop.f32.mrb[10].mxu1  ;;  %v521_v59 = vmax.f32 %v395_v47, 0.0 }
 0x160   : > { %v561_v48 = vmul.f32 %v2383_v0, %v522_v40  ;;  %v404_v50 = vpop.f32.mrb[11].mxu0  ;;  %v484_v51 = vpop.f32.mrb[11].mxu1  ;;  %v577_v52 = vmul.f32 %v2383_v0, %v538_v41  ;;  %v410_v53 = vadd.f32 %v1705_v44, %v2375_v56  ;;  %v490_v1 = vadd.f32 %v1729_v45, %v2375_v56 }
 0x161   : > { %v560_v6 = vmul.f32 %v2383_v0, %v521_v59  ;;  %v405_v32 = vadd.f32 %v2375_v56, %v404_v50  ;;  %v485_v41 = vadd.f32 %v2375_v56, %v484_v51  ;;  %v533_v45 = vmax.f32 %v455_v17, 0.0 }
 0x162   : > { %602 = vadd.xlane.f32.xlu1 %v561_v48  ;;  %622 = vadd.xlane.f32.xlu0 %v571_v49  ;;  %v524_v63 = vmax.f32 %v410_v53, 0.0  ;;  %v540_v16 = vmax.f32 %v490_v1, 0.0  ;;  %v556_v49 = vmul.f32 %v2383_v0, %v517_v38  ;;  %v519_v51 = vmax.f32 %v385_v46, 0.0 }
 0x163   : > { %v1708_v54 = vpop.f32.mrb[12].mxu0  ;;  %v1732_v55 = vpop.f32.mrb[12].mxu1  ;;  %v523_v40 = vmax.f32 %v405_v32, 0.0  ;;  %v539_v47 = vmax.f32 %v485_v41, 0.0  ;;  %v475_v59 = vadd.f32 %v2375_v56, %v2408_v39 }
 0x164   : > { %v414_v61 = vpop.f32.mrb[13].mxu0  ;;  %v2418_v62 = vpop.f32.mrb[13].mxu1  ;;  %v563_v14 = vmul.f32 %v2383_v0, %v524_v63  ;;  %v579_v37 = vmul.f32 %v2383_v0, %v540_v16  ;;  %v420_v44 = vadd.f32 %v1708_v54, %v2375_v56  ;;  %v500_v50 = vadd.f32 %v1732_v55, %v2375_v56 }
 0x165   : > { %v562_v48 = vmul.f32 %v2383_v0, %v523_v40  ;;  %v578_v53 = vmul.f32 %v2383_v0, %v539_v47  ;;  %v572_v54 = vmul.f32 %v2383_v0, %v533_v45  ;;  %v558_v55 = vmul.f32 %v2383_v0, %v519_v51 }
 0x166   : > { %634 = vadd.xlane.f32.xlu1 %v577_v52  ;;  %588 = vadd.xlane.f32.xlu0 %v554_v60  ;;  %v526_v19 = vmax.f32 %v420_v44, 0.0  ;;  %v465_v52 = vadd.f32 %v2375_v56, %v2402_v28  ;;  %v542_v57 = vmax.f32 %v500_v50, 0.0  ;;  %v415_v60 = vadd.f32 %v2375_v56, %v414_v61 }
 0x167   : > { %v2422_v3 = vpop.f32.mrb[14].mxu0  ;;  %v1735_v4 = vpop.f32.mrb[14].mxu1  ;;  %v390_v63 = vadd.f32 %v2394_v20, %v2375_v56  ;;  %v537_v1 = vmax.f32 %v475_v59, 0.0  ;;  %v470_v61 = vadd.f32 %v2396_v21, %v2375_v56 }
 0x168   : > { %v424_v8 = vpop.f32.mrb[15].mxu0  ;;  %v510_v11 = vadd.f32 %v1735_v4, %v2375_v56  ;;  %v504_v12 = vpop.f32.mrb[15].mxu1  ;;  %v565_v24 = vmul.f32 %v2383_v0, %v526_v19  ;;  %v535_v58 = vmax.f32 %v465_v52, 0.0  ;;  %v581_v28 = vmul.f32 %v2383_v0, %v542_v57 }
 0x169   : > { %v425_v13 = vadd.f32 %v2375_v56, %v424_v8  ;;  %v505_v15 = vadd.f32 %v2375_v56, %v504_v12  ;;  %v525_v2 = vmax.f32 %v415_v60, 0.0  ;;  %v495_v4 = vadd.f32 %v2375_v56, %v2418_v62 }
 0x16a   : > { %600 = vadd.xlane.f32.xlu1 %v560_v6  ;;  %620 = vadd.xlane.f32.xlu0 %v570_v7  ;;  %v544_v18 = vmax.f32 %v510_v11, 0.0  ;;  %v574_v5 = vmul.f32 %v2383_v0, %v535_v58  ;;  %v430_v39 = vadd.f32 %v2422_v3, %v2375_v56  ;;  %v520_v6 = vmax.f32 %v390_v63, 0.0 }
 0x16b   : > { %v527_v23 = vmax.f32 %v425_v13, 0.0  ;;  %v543_v25 = vmax.f32 %v505_v15, 0.0  ;;  %v541_v7 = vmax.f32 %v495_v4, 0.0  ;;  %v564_v8 = vmul.f32 %v2383_v0, %v525_v2 }
 0x16c   : > { %v2435_v34 = vmul.f32 %v2383_v0, %v544_v18  ;;  %v576_v20 = vmul.f32 %v2383_v0, %v537_v1  ;;  %v528_v11 = vmax.f32 %v430_v39, 0.0  ;;  %v536_v62 = vmax.f32 %v470_v61, 0.0 }
 0x16d   : > { %v566_v35 = vmul.f32 %v2383_v0, %v527_v23  ;;  %v582_v36 = vmul.f32 %v2383_v0, %v543_v25  ;;  %v580_v12 = vmul.f32 %v2383_v0, %v541_v7  ;;  %v559_v13 = vmul.f32 %v2383_v0, %v520_v6 }
 0x16e   : > { %606 = vadd.xlane.f32.xlu1 %v563_v14  ;;  %594 = vadd.xlane.f32.xlu0 %v557_v33  ;;  %v567_v3 = vmul.f32 %v2383_v0, %v528_v11  ;;  %v575_v56 = vmul.f32 %v2383_v0, %v536_v62 }
 0x172   : > { %638 = vadd.xlane.f32.xlu1 %v579_v37  ;;  %626 = vadd.xlane.f32.xlu0 %v573_v43 }
 0x176   : > { %604 = vadd.xlane.f32.xlu1 %v562_v48  ;;  %592 = vadd.xlane.f32.xlu0 %v556_v49 }
 0x17a   : > { %636 = vadd.xlane.f32.xlu1 %v578_v53  ;;  %624 = vadd.xlane.f32.xlu0 %v572_v54 }
 0x17e   : > { %610 = vadd.xlane.f32.xlu1 %v565_v24  ;;  %596 = vadd.xlane.f32.xlu0 %v558_v55 }
 0x182   : > { %642 = vadd.xlane.f32.xlu1 %v581_v28  ;;  %628 = vadd.xlane.f32.xlu0 %v574_v5 }
 0x186   : > { %608 = vadd.xlane.f32.xlu1 %v564_v8  ;;  %632 = vadd.xlane.f32.xlu0 %v576_v20 }
 0x18a   : > { %640 = vadd.xlane.f32.xlu1 %v580_v12  ;;  %598 = vadd.xlane.f32.xlu0 %v559_v13 }
 0x18e   : > { %614 = vadd.xlane.f32.xlu1 %v567_v3  ;;  %630 = vadd.xlane.f32.xlu0 %v575_v56 }
 0x192   : > { %612 = vadd.xlane.f32.xlu1 %v566_v35 }
 0x196   : > { %644 = vadd.xlane.f32.xlu1 %v582_v36 }
 0x19a   : > { %646 = vadd.xlane.f32.xlu1 %v2435_v34 }
 0x1df   : > { %v619_v21 = vpop.xlane.xlu1 %618  ;;  %v587_v15 = vpop.xlane.xlu0 %586 }
 0x1e0   : > { %v750_v16 = vrot.slane %v619_v21, 4  ;;  %v654_v14 = vrot.slane %v587_v15, 4 }
 0x1e2   : > { %v751_v18 = vmax.f32 %v619_v21, %v750_v16  ;;  %v655_v22 = vmax.f32 %v587_v15, %v654_v14 }
 0x1e3   : > { %v585_v23 = vpop.xlane.xlu0 %584 }
 0x1e4   : > { %v752_v25 = vrot.slane %v751_v18, 2  ;;  %v656_v29 = vrot.slane %v655_v22, 2  ;;  %v648_v32 = vrot.slane %v585_v23, 4 }
 0x1e6   : > { %v753_v33 = vmax.f32 %v751_v18, %v752_v25  ;;  %v657_v37 = vmax.f32 %v655_v22, %v656_v29  ;;  %v649_v17 = vmax.f32 %v585_v23, %v648_v32 }
 0x1e7   : > { %v617_v0 = vpop.xlane.xlu0 %616 }
 0x1e8   : > { %v754_v38 = vrot.slane %v753_v33, 1  ;;  %v658_v40 = vrot.slane %v657_v37, 1  ;;  %v650_v35 = vrot.slane %v649_v17, 2  ;;  %v744_v36 = vrot.slane %v617_v0, 4 }
 0x1ea   : > { %v755_v41 = vmax.f32 %v753_v33, %v754_v38  ;;  %v659_v34 = vmax.f32 %v657_v37, %v658_v40  ;;  %v651_v43 = vmax.f32 %v649_v17, %v650_v35  ;;  %v745_v44 = vmax.f32 %v617_v0, %v744_v36 }
 0x1eb   : > { %v591_v45 = vpop.xlane.xlu0 %590 }
 0x1ec   : > { %v857_v46 = vsub.f32 %v619_v21, %v755_v41  ;;  %v841_v47 = vsub.f32 %v587_v15, %v659_v34  ;;  %v652_v48 = vrot.slane %v651_v43, 1  ;;  %v746_v49 = vrot.slane %v745_v44, 2 }
 0x1ed   : > { %v666_v19 = vrot.slane %v591_v45, 4 }
 0x1ee   : > { %v906_v50 = vmul.f32 1.442695, %v857_v46  ;;  %v874_v51 = vmul.f32 1.442695, %v841_v47  ;;  %v653_v52 = vmax.f32 %v651_v43, %v652_v48  ;;  %v747_v53 = vmax.f32 %v745_v44, %v746_v49 }
 0x1ef   : > { %v667_v54 = vmax.f32 %v591_v45, %v666_v19  ;;  %v603_v57 = vpop.xlane.xlu1 %602  ;;  %v623_v24 = vpop.xlane.xlu0 %622 }
 0x1f0   : > { %1845 = vpow2.f32 %v906_v50  ;;  %v840_v58 = vsub.f32 %v585_v23, %v653_v52  ;;  %v748_v59 = vrot.slane %v747_v53, 1  ;;  %v702_v60 = vrot.slane %v603_v57, 4 }
 0x1f1   : > { %1847 = vpow2.f32 %v874_v51  ;;  %v668_v55 = vrot.slane %v667_v54, 2  ;;  %v762_v28 = vrot.slane %v623_v24, 4 }
 0x1f2   : > { %v872_v63 = vmul.f32 1.442695, %v840_v58  ;;  %v749_v1 = vmax.f32 %v747_v53, %v748_v59  ;;  %v703_v2 = vmax.f32 %v603_v57, %v702_v60 }
 0x1f3   : > { %v669_v4 = vmax.f32 %v667_v54, %v668_v55  ;;  %v763_v5 = vmax.f32 %v623_v24, %v762_v28  ;;  %v2476_v39 = vpop.xlane.xlu1 %634  ;;  %v2478_v61 = vpop.xlane.xlu0 %588 }
 0x1f4   : > { %1849 = vpow2.f32 %v872_v63  ;;  %v856_v6 = vsub.f32 %v617_v0, %v749_v1  ;;  %v704_v7 = vrot.slane %v703_v2, 2  ;;  %v798_v8 = vrot.slane %v2476_v39, 4 }
 0x1f5   : > { %v670_v20 = vrot.slane %v669_v4, 1  ;;  %v764_v11 = vrot.slane %v763_v5, 2  ;;  %v660_v62 = vrot.slane %v2478_v61, 4 }
 0x1f6   : > { %v904_v12 = vmul.f32 1.442695, %v856_v6  ;;  %v705_v13 = vmax.f32 %v703_v2, %v704_v7  ;;  %v799_v3 = vmax.f32 %v2476_v39, %v798_v8 }
 0x1f7   : > { %v671_v56 = vmax.f32 %v669_v4, %v670_v20  ;;  %v765_v21 = vmax.f32 %v763_v5, %v764_v11  ;;  %v661_v15 = vmax.f32 %v2478_v61, %v660_v62  ;;  %v2484_v16 = vpop.xlane.xlu1 %600  ;;  %v2486_v14 = vpop.xlane.xlu0 %620 }
 0x1f8   : > { %1851 = vpow2.f32 %v904_v12  ;;  %v706_v18 = vrot.slane %v705_v13, 1  ;;  %v800_v22 = vrot.slane %v799_v3, 2  ;;  %v696_v23 = vrot.slane %v2484_v16, 4 }
 0x1f9   : > { %v843_v25 = vsub.f32 %v591_v45, %v671_v56  ;;  %v766_v29 = vrot.slane %v765_v21, 1  ;;  %v662_v32 = vrot.slane %v661_v15, 2  ;;  %v756_v38 = vrot.slane %v2486_v14, 4 }
 0x1fa   : > { %v2489_v33 = vpop.eup %1845  ;;  %v707_v37 = vmax.f32 %v705_v13, %v706_v18  ;;  %v801_v17 = vmax.f32 %v799_v3, %v800_v22  ;;  %v697_v0 = vmax.f32 %v2484_v16, %v696_v23 }
 0x1fb   : > { %v2493_v40 = vpop.eup %1847  ;;  %v1038_v35 = vrot.slane %v2489_v33, 4  ;;  %v878_v36 = vmul.f32 1.442695, %v843_v25  ;;  %v767_v41 = vmax.f32 %v765_v21, %v766_v29  ;;  %v663_v34 = vmax.f32 %v661_v15, %v662_v32  ;;  %v2509_v12 = vpop.xlane.xlu1 %606 }
 0x1fc   : > { %v942_v43 = vrot.slane %v2493_v40, 4  ;;  %v849_v44 = vsub.f32 %v603_v57, %v707_v37  ;;  %v802_v45 = vrot.slane %v801_v17, 1  ;;  %v698_v46 = vrot.slane %v697_v0, 2 }
 0x1fd   : > { %v1039_v47 = vadd.f32 %v2489_v33, %v1038_v35  ;;  %1853 = vpow2.f32 %v878_v36  ;;  %v859_v48 = vsub.f32 %v623_v24, %v767_v41  ;;  %v664_v49 = vrot.slane %v663_v34, 1 }
 0x1fe   : > { %v2498_v19 = vpop.eup %1849  ;;  %v943_v50 = vadd.f32 %v2493_v40, %v942_v43  ;;  %v890_v51 = vmul.f32 1.442695, %v849_v44  ;;  %v803_v52 = vmax.f32 %v801_v17, %v802_v45  ;;  %v699_v53 = vmax.f32 %v697_v0, %v698_v46 }
 0x1ff   : > { %v1040_v54 = vrot.slane %v1039_v47, 2  ;;  %v936_v58 = vrot.slane %v2498_v19, 4  ;;  %v910_v59 = vmul.f32 1.442695, %v859_v48  ;;  %v665_v57 = vmax.f32 %v663_v34, %v664_v49 }
 0x200   : > { %v944_v60 = vrot.slane %v943_v50, 2  ;;  %v700_v55 = vrot.slane %v699_v53, 1  ;;  %1855 = vpow2.f32 %v890_v51  ;;  %v865_v2 = vsub.f32 %v2476_v39, %v803_v52 }
 0x201   : > { %v1041_v28 = vadd.f32 %v1040_v54, %v1039_v47  ;;  %v937_v63 = vadd.f32 %v2498_v19, %v936_v58  ;;  %1857 = vpow2.f32 %v910_v59  ;;  %v757_v4 = vmax.f32 %v2486_v14, %v756_v38  ;;  %v2517_v38 = vpop.xlane.xlu0 %594 }
 0x202   : > { %v2503_v24 = vpop.eup %1851  ;;  %v945_v1 = vadd.f32 %v944_v60, %v943_v50  ;;  %v701_v8 = vmax.f32 %v699_v53, %v700_v55  ;;  %v842_v11 = vsub.f32 %v2478_v61, %v665_v57  ;;  %v922_v15 = vmul.f32 1.442695, %v865_v2 }
 0x203   : > { %v1042_v5 = vrot.slane %v1041_v28, 1  ;;  %v938_v6 = vrot.slane %v937_v63, 2  ;;  %v1032_v7 = vrot.slane %v2503_v24, 4  ;;  %v758_v62 = vrot.slane %v757_v4, 2 }
 0x204   : > { %v946_v20 = vrot.slane %v945_v1, 1  ;;  %v848_v25 = vsub.f32 %v2484_v16, %v701_v8  ;;  %v714_v29 = vrot.slane %v2509_v12, 4  ;;  %v876_v32 = vmul.f32 1.442695, %v842_v11 }
 0x205   : > { %v1043_v13 = vadd.f32 %v1042_v5, %v1041_v28  ;;  %v939_v3 = vadd.f32 %v938_v6, %v937_v63  ;;  %v1033_v56 = vadd.f32 %v2503_v24, %v1032_v7  ;;  %v759_v39 = vmax.f32 %v757_v4, %v758_v62 }
 0x206   : > { %v947_v21 = vadd.f32 %v946_v20, %v945_v1  ;;  %v888_v41 = vmul.f32 1.442695, %v848_v25  ;;  %v715_v16 = vmax.f32 %v2509_v12, %v714_v29  ;;  %v678_v44 = vrot.slane %v2517_v38, 4  ;;  %v2538_v20 = vpop.xlane.xlu1 %638 }
 0x207   : > { %v2512_v18 = vpop.eup %1853  ;;  %v940_v22 = vrot.slane %v939_v3, 1  ;;  %v1034_v23 = vrot.slane %v1033_v56, 2  ;;  %v760_v37 = vrot.slane %v759_v39, 1  ;;  %1859 = vrcp.f32 %v1043_v13 }
 0x208   : > { %v954_v61 = vrot.slane %v2512_v18, 4  ;;  %1861 = vrcp.f32 %v947_v21  ;;  %v716_v48 = vrot.slane %v715_v16, 2  ;;  %v679_v51 = vmax.f32 %v2517_v38, %v678_v44 }
 0x209   : > { %v941_v17 = vadd.f32 %v940_v22, %v939_v3  ;;  %v1035_v0 = vadd.f32 %v1034_v23, %v1033_v56  ;;  %1863 = vpow2.f32 %v922_v15  ;;  %v761_v43 = vmax.f32 %v759_v39, %v760_v37 }
 0x20a   : > { %v2519_v35 = vpop.eup %1855  ;;  %v955_v36 = vadd.f32 %v2512_v18, %v954_v61  ;;  %1865 = vpow2.f32 %v876_v32  ;;  %v717_v59 = vmax.f32 %v715_v16, %v716_v48  ;;  %v680_v63 = vrot.slane %v679_v51, 2 }
 0x20b   : > { %v2523_v34 = vpop.eup %1857  ;;  %1867 = vrcp.f32 %v941_v17  ;;  %v1036_v45 = vrot.slane %v1035_v0, 1  ;;  %v990_v46 = vrot.slane %v2519_v35, 4  ;;  %v858_v50 = vsub.f32 %v2486_v14, %v761_v43 }
 0x20c   : > { %v956_v47 = vrot.slane %v955_v36, 2  ;;  %1869 = vpow2.f32 %v888_v41  ;;  %v1050_v49 = vrot.slane %v2523_v34, 4  ;;  %v718_v7 = vrot.slane %v717_v59, 1 }
 0x20d   : > { %v1037_v52 = vadd.f32 %v1036_v45, %v1035_v0  ;;  %v991_v53 = vadd.f32 %v2519_v35, %v990_v46  ;;  %v908_v55 = vmul.f32 1.442695, %v858_v50  ;;  %v681_v13 = vmax.f32 %v679_v51, %v680_v63 }
 0x20e   : > { %v957_v58 = vadd.f32 %v956_v47, %v955_v36  ;;  %v1051_v57 = vadd.f32 %v2523_v34, %v1050_v49  ;;  %v719_v39 = vmax.f32 %v717_v59, %v718_v7  ;;  %v810_v22 = vrot.slane %v2538_v20, 4 }
 0x20f   : > { %1871 = vrcp.f32 %v1037_v52  ;;  %v992_v14 = vrot.slane %v991_v53, 2  ;;  %v682_v61 = vrot.slane %v681_v13, 1 }
 0x210   : > { %v958_v6 = vrot.slane %v957_v58, 1  ;;  %v1052_v8 = vrot.slane %v1051_v57, 2  ;;  %1873 = vpow2.f32 %v908_v55  ;;  %v811_v0 = vmax.f32 %v2538_v20, %v810_v22  ;;  %v2567_v22 = vpop.xlane.xlu1 %604 }
 0x211   : > { %v1860_v54 = vpop.eup %1859  ;;  %v993_v56 = vadd.f32 %v992_v14, %v991_v53  ;;  %v683_v44 = vmax.f32 %v681_v13, %v682_v61 }
 0x212   : > { %v1862_v60 = vpop.eup %1861  ;;  %v1163_v2 = vmul.f32 %v1860_v54, %v2489_v33  ;;  %v959_v15 = vadd.f32 %v958_v6, %v957_v58  ;;  %v1053_v23 = vadd.f32 %v1052_v8, %v1051_v57  ;;  %v812_v52 = vrot.slane %v811_v0, 2  ;;  %v2558_v54 = vpop.xlane.xlu0 %626 }
 0x213   : > { %v2532_v28 = vpop.eup %1863  ;;  %v1131_v5 = vmul.f32 %v1862_v60, %v2493_v40  ;;  %v994_v37 = vrot.slane %v993_v56, 1  ;;  %v845_v60 = vsub.f32 %v2517_v38, %v683_v44 }
 0x214   : > { %v2534_v1 = vpop.eup %1865  ;;  %v1086_v62 = vrot.slane %v2532_v28, 4  ;;  %v1209_v3 = vmul.f32 %v1163_v2, %v2331_v27  ;;  %1875 = vrcp.f32 %v959_v15  ;;  %v1054_v41 = vrot.slane %v1053_v23, 1 }
 0x215   : > { %v1868_v4 = vpop.eup %1867  ;;  %v948_v21 = vrot.slane %v2534_v1, 4  ;;  %v1193_v40 = vmul.f32 %v1131_v5, %v2328_v26  ;;  %v851_v26 = vsub.f32 %v2509_v12, %v719_v39  ;;  %v813_v57 = vmax.f32 %v811_v0, %v812_v52 }
 0x216   : > { %v2540_v11 = vpop.eup %1869  ;;  %v1129_v33 = vmul.f32 %v1868_v4, %v2498_v19  ;;  %v1087_v29 = vadd.f32 %v2532_v28, %v1086_v62  ;;  %v1326_v32 = vrot.slane %v1209_v3, 4  ;;  %v1055_v12 = vadd.f32 %v1054_v41, %v1053_v23 }
 0x217   : > { %v984_v25 = vrot.slane %v2540_v11, 4  ;;  %v949_v19 = vadd.f32 %v2534_v1, %v948_v21  ;;  %v1230_v17 = vrot.slane %v1193_v40, 4  ;;  %v894_v51 = vmul.f32 1.442695, %v851_v26 }
 0x218   : > { %v1192_v27 = vmul.f32 %v1129_v33, %v2320_v9  ;;  %v1088_v43 = vrot.slane %v1087_v29, 2  ;;  %v1327_v46 = vadd.f32 %v1326_v32, %v1209_v3  ;;  %v995_v9 = vadd.f32 %v994_v37, %v993_v56 }
 0x219   : > { %v1872_v36 = vpop.eup %1871  ;;  %v985_v16 = vadd.f32 %v2540_v11, %v984_v25  ;;  %v950_v48 = vrot.slane %v949_v19, 2  ;;  %v1231_v49 = vadd.f32 %v1230_v17, %v1193_v40  ;;  %v882_v62 = vmul.f32 1.442695, %v845_v60 }
 0x21a   : > { %v2555_v45 = vpop.eup %1873  ;;  %v1224_v47 = vrot.slane %v1192_v27, 4  ;;  %v1161_v50 = vmul.f32 %v1872_v36, %v2503_v24  ;;  %v1089_v58 = vadd.f32 %v1088_v43, %v1087_v29  ;;  %v1328_v55 = vrot.slane %v1327_v46, 2 }
 0x21b   : > { %v986_v53 = vrot.slane %v985_v16, 2  ;;  %v1044_v59 = vrot.slane %v2555_v45, 4  ;;  %1877 = vrcp.f32 %v995_v9  ;;  %v951_v2 = vadd.f32 %v950_v48, %v949_v19 }
 0x21c   : > { %v1225_v63 = vadd.f32 %v1224_v47, %v1192_v27  ;;  %v1232_v14 = vrot.slane %v1231_v49, 2  ;;  %v1208_v4 = vmul.f32 %v1161_v50, %v2323_v10  ;;  %1879 = vpow2.f32 %v894_v51  ;;  %v2569_v27 = vpop.xlane.xlu0 %592  ;;  %v2575_v47 = vpop.xlane.xlu1 %636 }
 0x21d   : > { %v774_v24 = vrot.slane %v2558_v54, 4  ;;  %1881 = vrcp.f32 %v1055_v12  ;;  %v987_v5 = vadd.f32 %v986_v53, %v985_v16  ;;  %v1090_v7 = vrot.slane %v1089_v58, 1 }
 0x21e   : > { %v1876_v6 = vpop.eup %1875  ;;  %v1045_v8 = vadd.f32 %v2555_v45, %v1044_v59  ;;  %v814_v13 = vrot.slane %v813_v57, 1  ;;  %v1329_v38 = vadd.f32 %v1328_v55, %v1327_v46  ;;  %v1226_v3 = vrot.slane %v1225_v63, 2 }
 0x21f   : > { %v952_v33 = vrot.slane %v951_v2, 1  ;;  %v1233_v56 = vadd.f32 %v1232_v14, %v1231_v49  ;;  %v1320_v21 = vrot.slane %v1208_v4, 4  ;;  %v775_v15 = vmax.f32 %v2558_v54, %v774_v24 }
 0x220   : > { %v815_v40 = vmax.f32 %v813_v57, %v814_v13  ;;  %v1135_v10 = vmul.f32 %v1876_v6, %v2512_v18  ;;  %v988_v39 = vrot.slane %v987_v5, 1  ;;  %v1091_v23 = vadd.f32 %v1090_v7, %v1089_v58  ;;  %v2583_v52 = vpop.xlane.xlu0 %624  ;;  %v2601_v7 = vpop.xlane.xlu1 %610 }
 0x221   : > { %v1046_v25 = vrot.slane %v1045_v8, 2  ;;  %1883 = vpow2.f32 %v882_v62  ;;  %v1330_v29 = vrot.slane %v1329_v38, 1  ;;  %v1227_v61 = vadd.f32 %v1226_v3, %v1225_v63 }
 0x222   : > { %v953_v32 = vadd.f32 %v952_v33, %v951_v2  ;;  %v1234_v37 = vrot.slane %v1233_v56, 1  ;;  %v1321_v19 = vadd.f32 %v1320_v21, %v1208_v4  ;;  %v867_v17 = vsub.f32 %v2538_v20, %v815_v40 }
 0x223   : > { %v776_v26 = vrot.slane %v775_v15, 2  ;;  %v1195_v36 = vmul.f32 %v1135_v10, %v2338_v30  ;;  %v989_v18 = vadd.f32 %v988_v39, %v987_v5  ;;  %1885 = vrcp.f32 %v1091_v23 }
 0x224   : > { %v1047_v16 = vadd.f32 %v1046_v25, %v1045_v8  ;;  %v1228_v44 = vrot.slane %v1227_v61, 1  ;;  %1887 = vrcp.f32 %v953_v32  ;;  %v926_v46 = vmul.f32 1.442695, %v867_v17  ;;  %v2608_v23 = vpop.xlane.xlu0 %596 }
 0x225   : > { %v1878_v0 = vpop.eup %1877  ;;  %v2577_v9 = vadd.f32 %v1330_v29, %v1329_v38  ;;  %v2579_v48 = vadd.f32 %v1234_v37, %v1233_v56  ;;  %v1322_v20 = vrot.slane %v1321_v19, 2  ;;  %v777_v49 = vmax.f32 %v775_v15, %v776_v26 }
 0x226   : > { %v2573_v41 = vpop.eup %1879  ;;  %v1242_v50 = vrot.slane %v1195_v36, 4  ;;  %v1147_v30 = vmul.f32 %v1878_v0, %v2519_v35  ;;  %1889 = vrcp.f32 %v989_v18  ;;  %v1048_v53 = vrot.slane %v1047_v16, 1 }
 0x227   : > { %v1882_v43 = vpop.eup %1881  ;;  %v1002_v51 = vrot.slane %v2573_v41, 4  ;;  %v778_v58 = vrot.slane %v777_v49, 1  ;;  %v708_v59 = vrot.slane %v2567_v22, 4  ;;  %v2587_v60 = vadd.f32 %v1228_v44, %v1227_v61 }
 0x228   : > { %v1167_v12 = vmul.f32 %v1882_v43, %v2523_v34  ;;  %1891 = vpow2.f32 %v926_v46  ;;  %v672_v57 = vrot.slane %v2569_v27, 4  ;;  %v804_v55 = vrot.slane %v2575_v47, 4 }
 0x229   : > { %v2593_v35 = vadd.f32 %v1322_v20, %v1321_v19  ;;  %v779_v2 = vmax.f32 %v777_v49, %v778_v58  ;;  %v709_v14 = vmax.f32 %v2567_v22, %v708_v59  ;;  %v768_v34 = vrot.slane %v2583_v52, 4 }
 0x22a   : > { %v1201_v4 = vmul.f32 %v1147_v30, %v2356_v42  ;;  %v1003_v24 = vadd.f32 %v2573_v41, %v1002_v51  ;;  %v673_v5 = vmax.f32 %v2569_v27, %v672_v57  ;;  %v805_v6 = vmax.f32 %v2575_v47, %v804_v55 }
 0x22b   : > { %v2591_v63 = vpop.eup %1883  ;;  %v1243_v8 = vadd.f32 %v1242_v50, %v1195_v36  ;;  %v861_v62 = vsub.f32 %v2558_v54, %v779_v2  ;;  %v710_v13 = vrot.slane %v709_v14, 2  ;;  %v769_v38 = vmax.f32 %v2583_v52, %v768_v34 }
 0x22c   : > { %v1211_v3 = vmul.f32 %v1167_v12, %v2341_v31  ;;  %v966_v33 = vrot.slane %v2591_v63, 4  ;;  %v674_v56 = vrot.slane %v673_v5, 2  ;;  %v806_v42 = vrot.slane %v805_v6, 2 }
 0x22d   : > { %v1886_v21 = vpop.eup %1885  ;;  %v914_v40 = vmul.f32 1.442695, %v861_v62  ;;  %v711_v15 = vmax.f32 %v709_v14, %v710_v13  ;;  %v770_v10 = vrot.slane %v769_v38, 2  ;;  %v726_v39 = vrot.slane %v2601_v7, 4 }
 0x22e   : > { %v1888_v25 = vpop.eup %1887  ;;  %v1049_v29 = vadd.f32 %v1048_v53, %v1047_v16  ;;  %v1004_v54 = vrot.slane %v1003_v24, 2  ;;  %v675_v61 = vmax.f32 %v673_v5, %v674_v56  ;;  %v807_v32 = vmax.f32 %v805_v6, %v806_v42  ;;  %v1973_v56 = vld [vmem:[%s2309_s6 + $0xc8] sm:$0xff] }
 0x22f   : > { %1893 = vpow2.f32 %v914_v40  ;;  %v712_v37 = vrot.slane %v711_v15, 1  ;;  %v771_v31 = vmax.f32 %v769_v38, %v770_v10  ;;  %v727_v19 = vmax.f32 %v2601_v7, %v726_v39  ;;  %v2626_v38 = vpop.xlane.xlu1 %642 }
 0x230   : > { %v2611_v17 = vpop.eup %1889  ;;  %v967_v26 = vadd.f32 %v2591_v63, %v966_v33  ;;  %v676_v0 = vrot.slane %v675_v61, 1  ;;  %v808_v36 = vrot.slane %v807_v32, 1  ;;  %v684_v18 = vrot.slane %v2608_v23, 4 }
 0x231   : > { %v1324_v43 = vrot.slane %v2593_v35, 1  ;;  %v713_v44 = vmax.f32 %v711_v15, %v712_v37  ;;  %v772_v16 = vrot.slane %v771_v31, 1  ;;  %v728_v46 = vrot.slane %v727_v19, 2 }
 0x232   : > { %v2616_v20 = vpop.eup %1891  ;;  %v1278_v49 = vrot.slane %v1201_v4, 4  ;;  %v1179_v50 = vmul.f32 %v1886_v21, %v2532_v28  ;;  %v677_v30 = vmax.f32 %v675_v61, %v676_v0  ;;  %v809_v51 = vmax.f32 %v807_v32, %v808_v36 }
 0x233   : > { %v1005_v12 = vadd.f32 %v1004_v54, %v1003_v24  ;;  %v850_v53 = vsub.f32 %v2567_v22, %v713_v44  ;;  %v773_v58 = vmax.f32 %v771_v31, %v772_v16  ;;  %v729_v59 = vmax.f32 %v727_v19, %v728_v46  ;;  %v2642_v36 = vpop.xlane.xlu1 %608 }
 0x234   : > { %v1244_v57 = vrot.slane %v1243_v8, 2  ;;  %v968_v55 = vrot.slane %v967_v26, 2  ;;  %v844_v2 = vsub.f32 %v2569_v27, %v677_v30  ;;  %v685_v14 = vmax.f32 %v2608_v23, %v684_v18 }
 0x235   : > { %v1338_v34 = vrot.slane %v1211_v3, 4  ;;  %v1098_v5 = vrot.slane %v2616_v20, 4  ;;  %v892_v6 = vmul.f32 1.442695, %v850_v53  ;;  %v866_v28 = vsub.f32 %v2575_v47, %v809_v51 }
 0x236   : > { %v1133_v62 = vmul.f32 %v1888_v25, %v2534_v1  ;;  %v880_v24 = vmul.f32 1.442695, %v844_v2  ;;  %v860_v22 = vsub.f32 %v2583_v52, %v773_v58  ;;  %v730_v13 = vrot.slane %v729_v59, 1  ;;  %v2635_v25 = vpop.xlane.xlu0 %628 }
 0x237   : > { %v1279_v33 = vadd.f32 %v1278_v49, %v1201_v4  ;;  %v1217_v42 = vmul.f32 %v1973_v56, %v1179_v50  ;;  %1895 = vrcp.f32 %v1049_v29  ;;  %v1006_v27 = vrot.slane %v1005_v12, 1 }
 0x238   : > { %v2629_v21 = vadd.f32 %v1244_v57, %v1243_v8  ;;  %v969_v40 = vadd.f32 %v968_v55, %v967_v26  ;;  %1897 = vpow2.f32 %v892_v6  ;;  %v686_v15 = vrot.slane %v685_v14, 2  ;;  %v1974_v8 = vld [vmem:[%s2309_s6 + $0x10] sm:$0xff] }
 0x239   : > { %v2631_v47 = vpop.eup %1893  ;;  %v1339_v1 = vadd.f32 %v1338_v34, %v1211_v3  ;;  %v1099_v10 = vadd.f32 %v2616_v20, %v1098_v5  ;;  %v924_v52 = vmul.f32 1.442695, %v866_v28  ;;  %v822_v39 = vrot.slane %v2626_v38, 4 }
 0x23a   : > { %v1062_v4 = vrot.slane %v2631_v47, 4  ;;  %1899 = vpow2.f32 %v880_v24  ;;  %v912_v29 = vmul.f32 1.442695, %v860_v22  ;;  %v731_v54 = vmax.f32 %v729_v59, %v730_v13 }
 0x23b   : > { %v1194_v61 = vmul.f32 %v1974_v8, %v1133_v62  ;;  %v1007_v32 = vadd.f32 %v1006_v27, %v1005_v12  ;;  %v687_v37 = vmax.f32 %v685_v14, %v686_v15  ;;  %v823_v31 = vmax.f32 %v2626_v38, %v822_v39 }
 0x23c   : > { %v1280_v19 = vrot.slane %v1279_v33, 2  ;;  %v970_v3 = vrot.slane %v969_v40, 1  ;;  %v1063_v26 = vadd.f32 %v2631_v47, %v1062_v4  ;;  %v780_v0 = vrot.slane %v2635_v25, 4 }
 0x23d   : > { %v1100_v18 = vrot.slane %v1099_v10, 2  ;;  %1901 = vpow2.f32 %v924_v52  ;;  %v688_v44 = vrot.slane %v687_v37, 1  ;;  %v824_v16 = vrot.slane %v823_v31, 2 }
 0x23e   : > { %v1064_v46 = vrot.slane %v1063_v26, 2  ;;  %1903 = vpow2.f32 %v912_v29  ;;  %v853_v49 = vsub.f32 %v2601_v7, %v731_v54  ;;  %v781_v50 = vmax.f32 %v2635_v25, %v780_v0 }
 0x23f   : > { %v1374_v30 = vrot.slane %v1217_v42, 4  ;;  %1905 = vrcp.f32 %v1007_v32  ;;  %v689_v51 = vmax.f32 %v687_v37, %v688_v44  ;;  %v720_v12 = vrot.slane %v2642_v36, 4 }
 0x240   : > { %v1340_v53 = vrot.slane %v1339_v1, 2  ;;  %v971_v58 = vadd.f32 %v970_v3, %v969_v40  ;;  %v825_v59 = vmax.f32 %v823_v31, %v824_v16  ;;  %v782_v57 = vrot.slane %v781_v50, 2  ;;  %v1975_v31 = vld [vmem:[%s2309_s6 + $0x40] sm:$0xff] }
 0x241   : > { %v1896_v55 = vpop.eup %1895  ;;  %v2650_v2 = vadd.f32 %v1324_v43, %v2593_v35  ;;  %v1281_v14 = vadd.f32 %v1280_v19, %v1279_v33  ;;  %v1236_v34 = vrot.slane %v1194_v61, 4  ;;  %v1101_v7 = vadd.f32 %v1100_v18, %v1099_v10  ;;  %v2659_v35 = vpop.xlane.xlu0 %632 }
 0x242   : > { %v2652_v5 = vpop.eup %1897  ;;  %v1246_v6 = vrot.slane %v2629_v21, 1  ;;  %v1065_v28 = vadd.f32 %v1064_v46, %v1063_v26  ;;  %v898_v62 = vmul.f32 1.442695, %v853_v49  ;;  %v783_v24 = vmax.f32 %v781_v50, %v782_v57 }
 0x243   : > { %v1375_v22 = vadd.f32 %v1374_v30, %v1217_v42  ;;  %v1145_v13 = vmul.f32 %v2611_v17, %v2540_v11  ;;  %v846_v56 = vsub.f32 %v2608_v23, %v689_v51  ;;  %v721_v27 = vmax.f32 %v2642_v36, %v720_v12 }
 0x244   : > { %v2661_v43 = vpop.eup %1899  ;;  %v2663_v33 = vadd.f32 %v1340_v53, %v1339_v1  ;;  %1907 = vrcp.f32 %v971_v58  ;;  %v826_v40 = vrot.slane %v825_v59, 1  ;;  %v784_v15 = vrot.slane %v783_v24, 1  ;;  %v2688_v53 = vpop.xlane.xlu1 %640 }
 0x245   : > { %v1282_v10 = vrot.slane %v1281_v14, 1  ;;  %v2665_v52 = vadd.f32 %v1236_v34, %v1194_v61  ;;  %v1102_v42 = vrot.slane %v1101_v7, 1  ;;  %v996_v11 = vrot.slane %v2652_v5, 4 }
 0x246   : > { %v1066_v17 = vrot.slane %v1065_v28, 1  ;;  %1909 = vpow2.f32 %v898_v62  ;;  %v785_v23 = vmax.f32 %v783_v24, %v784_v15  ;;  %v792_v39 = vrot.slane %v2659_v35, 4 }
 0x247   : > { %v2669_v4 = vpop.eup %1901  ;;  %v2672_v1 = vadd.f32 %v1246_v6, %v2629_v21  ;;  %v960_v29 = vrot.slane %v2661_v43, 4  ;;  %v884_v54 = vmul.f32 1.442695, %v846_v56  ;;  %v722_v8 = vrot.slane %v721_v27, 2 }
 0x248   : > { %v2675_v32 = vpop.eup %1903  ;;  %v1342_v61 = vrot.slane %v2663_v33, 1  ;;  %v1376_v37 = vrot.slane %v1375_v22, 2  ;;  %v1200_v19 = vmul.f32 %v1975_v31, %v1145_v13  ;;  %v827_v3 = vmax.f32 %v825_v59, %v826_v40 }
 0x249   : > { %v1906_v26 = vpop.eup %1905  ;;  %v1238_v0 = vrot.slane %v2665_v52, 2  ;;  %v1103_v18 = vadd.f32 %v1102_v42, %v1101_v7  ;;  %v997_v44 = vadd.f32 %v2652_v5, %v996_v11  ;;  %v862_v21 = vsub.f32 %v2635_v25, %v785_v23 }
 0x24a   : > { %v2682_v16 = vadd.f32 %v1282_v10, %v1281_v14  ;;  %v1067_v46 = vadd.f32 %v1066_v17, %v1065_v28  ;;  %v1092_v49 = vrot.slane %v2669_v4, 4  ;;  %v793_v50 = vmax.f32 %v2659_v35, %v792_v39 }
 0x24b   : > { %v961_v30 = vadd.f32 %v2661_v43, %v960_v29  ;;  %v1056_v51 = vrot.slane %v2675_v32, 4  ;;  %1911 = vpow2.f32 %v884_v54  ;;  %v723_v12 = vmax.f32 %v721_v27, %v722_v8  ;;  %v1977_v27 = vld [vmem:[%s2309_s6 + $0x58] sm:$0xff] }
 0x24c   : > { %v2690_v58 = vadd.f32 %v1376_v37, %v1375_v22  ;;  %v1165_v59 = vmul.f32 %v1896_v55, %v2555_v45  ;;  %v1151_v25 = vmul.f32 %v1906_v26, %v2573_v41  ;;  %v869_v57 = vsub.f32 %v2626_v38, %v827_v3  ;;  %v1976_v38 = vld [vmem:[%s2309_s6 + $0x90] sm:$0xff] }
 0x24d   : > { %1913 = vrcp.f32 %v1103_v18  ;;  %v998_v14 = vrot.slane %v997_v44, 2  ;;  %v916_v34 = vmul.f32 1.442695, %v862_v21  ;;  %v724_v7 = vrot.slane %v723_v12, 1 }
 0x24e   : > { %v1908_v6 = vpop.eup %1907  ;;  %1915 = vrcp.f32 %v1067_v46  ;;  %v1093_v28 = vadd.f32 %v2669_v4, %v1092_v49  ;;  %v794_v62 = vrot.slane %v793_v50, 2  ;;  %v816_v24 = vrot.slane %v2688_v53, 4 }
 0x24f   : > { %v1272_v22 = vrot.slane %v1200_v19, 4  ;;  %v962_v13 = vrot.slane %v961_v30, 2  ;;  %v1057_v45 = vadd.f32 %v2675_v32, %v1056_v51  ;;  %v725_v41 = vmax.f32 %v723_v12, %v724_v7 }
 0x250   : > { %v2698_v55 = vpop.eup %1909  ;;  %v1210_v56 = vmul.f32 %v1976_v38, %v1165_v59  ;;  %v1203_v40 = vmul.f32 %v1977_v27, %v1151_v25  ;;  %v930_v15 = vmul.f32 1.442695, %v869_v57  ;;  %v795_v10 = vmax.f32 %v793_v50, %v794_v62 }
 0x251   : > { %v1139_v42 = vmul.f32 %v1908_v6, %v2591_v63  ;;  %v999_v11 = vadd.f32 %v998_v14, %v997_v44  ;;  %1917 = vpow2.f32 %v916_v34  ;;  %v852_v17 = vsub.f32 %v2642_v36, %v725_v41  ;;  %v1978_v36 = vld [vmem:[%s2309_s6 + $0x28] sm:$0xff] }
 0x252   : > { %v2705_v23 = vadd.f32 %v1342_v61, %v2663_v33  ;;  %v1094_v39 = vrot.slane %v1093_v28, 2  ;;  %v796_v29 = vrot.slane %v795_v10, 1  ;;  %v817_v54 = vmax.f32 %v2688_v53, %v816_v24 }
 0x253   : > { %v963_v8 = vadd.f32 %v962_v13, %v961_v30  ;;  %v1058_v37 = vrot.slane %v1057_v45, 2  ;;  %v1014_v31 = vrot.slane %v2698_v55, 4  ;;  %v896_v3 = vmul.f32 1.442695, %v852_v17  ;;  %v2720_v13 = vpop.xlane.xlu0 %598 }
 0x254   : > { %v1332_v26 = vrot.slane %v1210_v56, 4  ;;  %v1290_v18 = vrot.slane %v1203_v40, 4  ;;  %1919 = vpow2.f32 %v930_v15  ;;  %v797_v63 = vmax.f32 %v795_v10, %v796_v29  ;;  %v1979_v29 = vld [vmem:[%s2309_s6 + $0xd8] sm:$0xff] }
 0x255   : > { %v2709_v44 = vpop.eup %1911  ;;  %v1273_v21 = vadd.f32 %v1272_v22, %v1200_v19  ;;  %v1197_v46 = vmul.f32 %v1978_v36, %v1139_v42  ;;  %v1000_v33 = vrot.slane %v999_v11, 1  ;;  %v818_v61 = vrot.slane %v817_v54, 2 }
 0x256   : > { %v2713_v49 = vadd.f32 %v1238_v0, %v2665_v52  ;;  %v1095_v50 = vadd.f32 %v1094_v39, %v1093_v28  ;;  %1921 = vpow2.f32 %v896_v3  ;;  %v864_v30 = vsub.f32 %v2659_v35, %v797_v63 }
 0x257   : > { %v1914_v51 = vpop.eup %1913  ;;  %v964_v12 = vrot.slane %v963_v8, 1  ;;  %v1059_v59 = vadd.f32 %v1058_v37, %v1057_v45  ;;  %v1015_v25 = vadd.f32 %v2698_v55, %v1014_v31  ;;  %v819_v57 = vmax.f32 %v817_v54, %v818_v61  ;;  %v1980_v31 = vld [vmem:[%s2309_s6 + $0xa8] sm:$0xff]  ;;  %v2738_v61 = vpop.xlane.xlu1 %614 }
 0x258   : > { %v1916_v14 = vpop.eup %1915  ;;  %v1333_v34 = vadd.f32 %v1332_v26, %v1210_v56  ;;  %v1291_v19 = vadd.f32 %v1290_v18, %v1203_v40  ;;  %v972_v7 = vrot.slane %v2709_v44, 4  ;;  %v920_v6 = vmul.f32 1.442695, %v864_v30 }
 0x259   : > { %v1378_v62 = vrot.slane %v2690_v58, 1  ;;  %v1274_v52 = vrot.slane %v1273_v21, 2  ;;  %v1254_v0 = vrot.slane %v1197_v46, 4  ;;  %v1001_v28 = vadd.f32 %v1000_v33, %v999_v11 }
 0x25a   : > { %v1183_v24 = vmul.f32 %v1914_v51, %v2616_v20  ;;  %v1096_v35 = vrot.slane %v1095_v50, 1  ;;  %1923 = vpow2.f32 %v920_v6  ;;  %v820_v22 = vrot.slane %v819_v57, 1 }
 0x25b   : > { %v2722_v45 = vpop.eup %1917  ;;  %v1171_v41 = vmul.f32 %v1916_v14, %v2631_v47  ;;  %v965_v38 = vadd.f32 %v964_v12, %v963_v8  ;;  %v1060_v56 = vrot.slane %v1059_v59, 1  ;;  %v1016_v27 = vrot.slane %v1015_v25, 2 }
 0x25c   : > { %v1240_v40 = vrot.slane %v2713_v49, 1  ;;  %v1334_v15 = vrot.slane %v1333_v34, 2  ;;  %v1292_v10 = vrot.slane %v1291_v19, 2  ;;  %v973_v20 = vadd.f32 %v2709_v44, %v972_v7 }
 0x25d   : > { %v1275_v42 = vadd.f32 %v1274_v52, %v1273_v21  ;;  %v1255_v11 = vadd.f32 %v1254_v0, %v1197_v46  ;;  %1925 = vrcp.f32 %v1001_v28  ;;  %v690_v17 = vrot.slane %v2720_v13, 4 }
 0x25e   : > { %v2728_v39 = vpop.eup %1919  ;;  %v1219_v54 = vmul.f32 %v1979_v29, %v1183_v24  ;;  %v1097_v47 = vadd.f32 %v1096_v35, %v1095_v50  ;;  %v1068_v8 = vrot.slane %v2722_v45, 4  ;;  %v821_v37 = vmax.f32 %v819_v57, %v820_v22 }
 0x25f   : > { %v1213_v3 = vmul.f32 %v1980_v31, %v1171_v41  ;;  %1927 = vrcp.f32 %v965_v38  ;;  %v1061_v26 = vadd.f32 %v1060_v56, %v1059_v59  ;;  %v1017_v18 = vadd.f32 %v1016_v27, %v1015_v25  ;;  %v2754_v38 = vpop.xlane.xlu1 %612 }
 0x260   : > { %v2733_v63 = vpop.eup %1921  ;;  %v2736_v21 = vadd.f32 %v1378_v62, %v2690_v58  ;;  %v1335_v36 = vadd.f32 %v1334_v15, %v1333_v34  ;;  %v1293_v46 = vadd.f32 %v1292_v10, %v1291_v19  ;;  %v974_v33 = vrot.slane %v973_v20, 2 }
 0x261   : > { %v1276_v30 = vrot.slane %v1275_v42, 1  ;;  %v1256_v50 = vrot.slane %v1255_v11, 2  ;;  %v1110_v51 = vrot.slane %v2728_v39, 4  ;;  %v691_v12 = vmax.f32 %v2720_v13, %v690_v17 }
 0x262   : > { %v1386_v57 = vrot.slane %v1219_v54, 4  ;;  %1929 = vrcp.f32 %v1097_v47  ;;  %v1069_v59 = vadd.f32 %v2722_v45, %v1068_v8  ;;  %v868_v25 = vsub.f32 %v2688_v53, %v821_v37 }
 0x263   : > { %v1350_v14 = vrot.slane %v1213_v3, 4  ;;  %1931 = vrcp.f32 %v1061_v26  ;;  %v1018_v58 = vrot.slane %v1017_v18, 1  ;;  %v1008_v34 = vrot.slane %v2733_v63, 4 }
 0x264   : > { %v2745_v19 = vpop.eup %1923  ;;  %v1336_v7 = vrot.slane %v1335_v36, 1  ;;  %v1294_v6 = vrot.slane %v1293_v46, 1  ;;  %v975_v62 = vadd.f32 %v974_v33, %v973_v20  ;;  %v928_v52 = vmul.f32 1.442695, %v868_v25  ;;  %v2778_v25 = vpop.xlane.xlu1 %644 }
 0x265   : > { %v2747_v0 = vadd.f32 %v1256_v50, %v1255_v11  ;;  %v1111_v28 = vadd.f32 %v2728_v39, %v1110_v51  ;;  %v1080_v24 = vrot.slane %v2745_v19, 4  ;;  %v692_v35 = vrot.slane %v691_v12, 2 }
 0x266   : > { %v2751_v22 = vadd.f32 %v1386_v57, %v1219_v54  ;;  %v1070_v53 = vrot.slane %v1069_v59, 2  ;;  %1933 = vpow2.f32 %v928_v52  ;;  %v738_v41 = vrot.slane %v2738_v61, 4 }
 0x267   : > { %v1926_v56 = vpop.eup %1925  ;;  %v2757_v27 = vadd.f32 %v1240_v40, %v2713_v49  ;;  %v2759_v15 = vadd.f32 %v1350_v14, %v1213_v3  ;;  %v1019_v10 = vadd.f32 %v1018_v58, %v1017_v18  ;;  %v1009_v20 = vadd.f32 %v2733_v63, %v1008_v34  ;;  %v2770_v40 = vpop.xlane.xlu0 %630 }
 0x268   : > { %v2762_v11 = vadd.f32 %v1276_v30, %v1275_v42  ;;  %v2764_v17 = vadd.f32 %v1336_v7, %v1335_v36  ;;  %v2766_v29 = vadd.f32 %v1294_v6, %v1293_v46  ;;  %v976_v54 = vrot.slane %v975_v62, 1  ;;  %v1981_v7 = vld [vmem:[%s2309_s6 + $0x50] sm:$0xff] }
 0x269   : > { %v1928_v47 = vpop.eup %1927  ;;  %v1258_v8 = vrot.slane %v2747_v0, 1  ;;  %v1112_v37 = vrot.slane %v1111_v28, 2  ;;  %v1081_v31 = vadd.f32 %v2745_v19, %v1080_v24  ;;  %v693_v49 = vmax.f32 %v691_v12, %v692_v35 }
 0x26a   : > { %v1388_v3 = vrot.slane %v2751_v22, 2  ;;  %v1149_v26 = vmul.f32 %v1926_v56, %v2652_v5  ;;  %v1071_v42 = vadd.f32 %v1070_v53, %v1069_v59  ;;  %v739_v18 = vmax.f32 %v2738_v61, %v738_v41 }
 0x26b   : > { %v1352_v36 = vrot.slane %v2759_v15, 2  ;;  %1935 = vrcp.f32 %v1019_v10  ;;  %v1010_v46 = vrot.slane %v1009_v20, 2  ;;  %v694_v33 = vrot.slane %v693_v49, 1 }
 0x26c   : > { %v1930_v30 = vpop.eup %1929  ;;  %v1137_v50 = vmul.f32 %v1928_v47, %v2661_v43  ;;  %v977_v51 = vadd.f32 %v976_v54, %v975_v62  ;;  %v740_v12 = vrot.slane %v739_v18, 2  ;;  %v786_v57 = vrot.slane %v2770_v40, 4 }
 0x26d   : > { %v1932_v5 = vpop.eup %1931  ;;  %v1113_v59 = vadd.f32 %v1112_v37, %v1111_v28  ;;  %v1082_v14 = vrot.slane %v1081_v31, 2  ;;  %v695_v58 = vmax.f32 %v693_v49, %v694_v33  ;;  %v732_v34 = vrot.slane %v2754_v38, 4  ;;  %v1982_v28 = vld [vmem:[%s2309_s6 + $0x20] sm:$0xff]  ;;  %v2791_v33 = vpop.xlane.xlu1 %646 }
 0x26e   : > { %v1202_v6 = vmul.f32 %v1981_v7, %v1149_v26  ;;  %v1072_v52 = vrot.slane %v1071_v42, 1  ;;  %v741_v24 = vmax.f32 %v739_v18, %v740_v12  ;;  %v787_v35 = vmax.f32 %v2770_v40, %v786_v57 }
 0x26f   : > { %v1181_v43 = vmul.f32 %v1930_v30, %v2669_v4  ;;  %v1011_v62 = vadd.f32 %v1010_v46, %v1009_v20  ;;  %v847_v53 = vsub.f32 %v2720_v13, %v695_v58  ;;  %v733_v41 = vmax.f32 %v2754_v38, %v732_v34 }
 0x270   : > { %v2786_v56 = vpop.eup %1933  ;;  %v1196_v10 = vmul.f32 %v1982_v28, %v1137_v50  ;;  %v1169_v54 = vmul.f32 %v1932_v5, %v2675_v32  ;;  %v742_v47 = vrot.slane %v741_v24, 1  ;;  %v788_v37 = vrot.slane %v787_v35, 2 }
 0x271   : > { %1937 = vrcp.f32 %v977_v51  ;;  %v1083_v49 = vadd.f32 %v1082_v14, %v1081_v31  ;;  %v1104_v26 = vrot.slane %v2786_v56, 4  ;;  %v886_v18 = vmul.f32 1.442695, %v847_v53  ;;  %v1983_v14 = vld [vmem:[%s2309_s6 + $0xd0] sm:$0xff] }
 0x272   : > { %v1114_v4 = vrot.slane %v1113_v59, 1  ;;  %v1073_v20 = vadd.f32 %v1072_v52, %v1071_v42  ;;  %v743_v46 = vmax.f32 %v741_v24, %v742_v47  ;;  %v789_v13 = vmax.f32 %v787_v35, %v788_v37 }
 0x273   : > { %v1012_v30 = vrot.slane %v1011_v62, 1  ;;  %v1105_v12 = vadd.f32 %v2786_v56, %v1104_v26  ;;  %1939 = vpow2.f32 %v886_v18  ;;  %v734_v50 = vrot.slane %v733_v41, 2 }
 0x274   : > { %v1284_v32 = vrot.slane %v1202_v6, 4  ;;  %v855_v57 = vsub.f32 %v2738_v61, %v743_v46  ;;  %v790_v51 = vrot.slane %v789_v13, 1  ;;  %v828_v31 = vrot.slane %v2778_v25, 4 }
 0x275   : > { %v1936_v5 = vpop.eup %1935  ;;  %v1218_v58 = vmul.f32 %v1983_v14, %v1181_v43  ;;  %v1084_v42 = vrot.slane %v1083_v49, 1  ;;  %v735_v34 = vmax.f32 %v733_v41, %v734_v50  ;;  %v834_v7 = vrot.slane %v2791_v33, 4  ;;  %v1984_v43 = vld [vmem:[%s2309_s6 + $0xa0] sm:$0xff] }
 0x276   : > { %v1115_v52 = vadd.f32 %v1114_v4, %v1113_v59  ;;  %v902_v24 = vmul.f32 1.442695, %v855_v57  ;;  %v791_v35 = vmax.f32 %v789_v13, %v790_v51  ;;  %v829_v53 = vmax.f32 %v2778_v25, %v828_v31 }
 0x277   : > { %1941 = vrcp.f32 %v1073_v20  ;;  %v1013_v28 = vadd.f32 %v1012_v30, %v1011_v62  ;;  %v1106_v47 = vrot.slane %v1105_v12, 2  ;;  %v736_v61 = vrot.slane %v735_v34, 1 }
 0x278   : > { %v1248_v37 = vrot.slane %v1196_v10, 4  ;;  %1943 = vpow2.f32 %v902_v24  ;;  %v863_v26 = vsub.f32 %v2770_v40, %v791_v35  ;;  %v830_v18 = vrot.slane %v829_v53, 2 }
 0x279   : > { %v1212_v46 = vmul.f32 %v1984_v43, %v1169_v54  ;;  %v1085_v14 = vadd.f32 %v1084_v42, %v1083_v49  ;;  %v737_v41 = vmax.f32 %v735_v34, %v736_v61  ;;  %v835_v50 = vmax.f32 %v2791_v33, %v834_v7 }
 0x27a   : > { %v1285_v59 = vadd.f32 %v1284_v32, %v1202_v6  ;;  %1945 = vrcp.f32 %v1115_v52  ;;  %v918_v4 = vmul.f32 1.442695, %v863_v26  ;;  %v831_v13 = vmax.f32 %v829_v53, %v830_v18 }
 0x27b   : > { %v1938_v57 = vpop.eup %1937  ;;  %1947 = vrcp.f32 %v1013_v28  ;;  %v1107_v62 = vadd.f32 %v1106_v47, %v1105_v12  ;;  %v854_v20 = vsub.f32 %v2754_v38, %v737_v41  ;;  %v836_v30 = vrot.slane %v835_v50, 2  ;;  %v1985_v28 = vld [vmem:[%s2309_s6 + $0x68] sm:$0xff] }
 0x27c   : > { %v2806_v40 = vadd.f32 %v1388_v3, %v2751_v22  ;;  %v1380_v54 = vrot.slane %v1218_v58, 4  ;;  %1949 = vpow2.f32 %v918_v4  ;;  %v832_v49 = vrot.slane %v831_v13, 1 }
 0x27d   : > { %v2808_v51 = vpop.eup %1939  ;;  %v1249_v6 = vadd.f32 %v1248_v37, %v1196_v10  ;;  %v1155_v32 = vmul.f32 %v1936_v5, %v2698_v55  ;;  %1951 = vrcp.f32 %v1085_v14  ;;  %v900_v31 = vmul.f32 1.442695, %v854_v20  ;;  %v1986_v20 = vld [vmem:[%s2309_s6 + $0x30] sm:$0xff] }
 0x27e   : > { %v1344_v12 = vrot.slane %v1212_v46, 4  ;;  %v978_v38 = vrot.slane %v2808_v51, 4  ;;  %v833_v42 = vmax.f32 %v831_v13, %v832_v49  ;;  %v837_v34 = vmax.f32 %v835_v50, %v836_v30 }
 0x27f   : > { %v2815_v22 = vadd.f32 %v1352_v36, %v2759_v15  ;;  %v1286_v3 = vrot.slane %v1285_v59, 2  ;;  %v1108_v7 = vrot.slane %v1107_v62, 1  ;;  %1953 = vpow2.f32 %v900_v31 }
 0x280   : > { %v1390_v10 = vrot.slane %v2806_v40, 1  ;;  %v979_v55 = vadd.f32 %v2808_v51, %v978_v38  ;;  %v870_v5 = vsub.f32 %v2778_v25, %v833_v42  ;;  %v838_v52 = vrot.slane %v837_v34, 1 }
 0x281   : > { %v1942_v24 = vpop.eup %1941  ;;  %v1250_v35 = vrot.slane %v1249_v6, 2  ;;  %v1381_v53 = vadd.f32 %v1380_v54, %v1218_v58  ;;  %v1205_v47 = vmul.f32 %v1985_v28, %v1155_v32  ;;  %v1141_v61 = vmul.f32 %v1938_v57, %v2709_v44 }
 0x282   : > { %v2822_v37 = vpop.eup %1943  ;;  %v1345_v15 = vadd.f32 %v1344_v12, %v1212_v46  ;;  %v980_v36 = vrot.slane %v979_v55, 2  ;;  %v932_v26 = vmul.f32 1.442695, %v870_v5  ;;  %v839_v18 = vmax.f32 %v837_v34, %v838_v52  ;;  %v1987_v34 = vld [vmem:[%s2309_s6 + $0xb0] sm:$0xff] }
 0x283   : > { %v1354_v43 = vrot.slane %v2815_v22, 1  ;;  %v1287_v14 = vadd.f32 %v1286_v3, %v1285_v59  ;;  %v1109_v41 = vadd.f32 %v1108_v7, %v1107_v62  ;;  %v1026_v25 = vrot.slane %v2822_v37, 4 }
 0x284   : > { %v1946_v50 = vpop.eup %1945  ;;  %v1173_v58 = vmul.f32 %v1942_v24, %v2722_v45  ;;  %v981_v4 = vadd.f32 %v980_v36, %v979_v55  ;;  %1955 = vpow2.f32 %v932_v26  ;;  %v871_v44 = vsub.f32 %v2791_v33, %v839_v18 }
 0x285   : > { %v1948_v13 = vpop.eup %1947  ;;  %v1382_v57 = vrot.slane %v1381_v53, 2  ;;  %v1302_v46 = vrot.slane %v1205_v47, 4  ;;  %v1198_v30 = vmul.f32 %v1986_v20, %v1141_v61  ;;  %v1027_v54 = vadd.f32 %v2822_v37, %v1026_v25  ;;  %v1988_v25 = vld [vmem:[%s2309_s6 + $0xe8] sm:$0xff]  ;;  %v1989_v20 = vld [vmem:[%s2309_s6 + $0x60] sm:$0xff] }
 0x286   : > { %v2830_v49 = vpop.eup %1949  ;;  %v1251_v59 = vadd.f32 %v1250_v35, %v1249_v6  ;;  %v1346_v62 = vrot.slane %v1345_v15, 2  ;;  %v982_v32 = vrot.slane %v981_v4, 1  ;;  %v934_v31 = vmul.f32 1.442695, %v871_v44 }
 0x287   : > { %v1952_v12 = vpop.eup %1951  ;;  %v1288_v45 = vrot.slane %v1287_v14, 1  ;;  %1957 = vrcp.f32 %v1109_v41  ;;  %v1028_v38 = vrot.slane %v1027_v54, 2  ;;  %v1074_v33 = vrot.slane %v2830_v49, 4 }
 0x288   : > { %v1187_v42 = vmul.f32 %v1946_v50, %v2728_v39  ;;  %v1214_v3 = vmul.f32 %v1987_v34, %v1173_v58  ;;  %v983_v7 = vadd.f32 %v982_v32, %v981_v4  ;;  %1959 = vpow2.f32 %v934_v31 }
 0x289   : > { %v2835_v55 = vpop.eup %1953  ;;  %v1383_v5 = vadd.f32 %v1382_v57, %v1381_v53  ;;  %v1260_v6 = vrot.slane %v1198_v30, 4  ;;  %v1029_v52 = vadd.f32 %v1028_v38, %v1027_v54  ;;  %v1075_v24 = vadd.f32 %v2830_v49, %v1074_v33 }
 0x28a   : > { %v1153_v35 = vmul.f32 %v1948_v13, %v2733_v63  ;;  %v1177_v28 = vmul.f32 %v1952_v12, %v2745_v19  ;;  %1961 = vrcp.f32 %v983_v7  ;;  %v1020_v61 = vrot.slane %v2835_v55, 4 }
 0x28b   : > { %v1252_v39 = vrot.slane %v1251_v59, 1  ;;  %v1303_v36 = vadd.f32 %v1302_v46, %v1205_v47  ;;  %v1030_v26 = vrot.slane %v1029_v52, 1  ;;  %v1076_v18 = vrot.slane %v1075_v24, 2  ;;  %v1990_v47 = vld [vmem:[%s2309_s6 + $0xc0] sm:$0xff] }
 0x28c   : > { %v1347_v41 = vadd.f32 %v1346_v62, %v1345_v15  ;;  %v1221_v53 = vmul.f32 %v1988_v25, %v1187_v42  ;;  %v1356_v50 = vrot.slane %v1214_v3, 4  ;;  %v1021_v58 = vadd.f32 %v2835_v55, %v1020_v61 }
 0x28d   : > { %v2843_v4 = vadd.f32 %v1288_v45, %v1287_v14  ;;  %v1384_v63 = vrot.slane %v1383_v5, 1  ;;  %v1031_v44 = vadd.f32 %v1030_v26, %v1029_v52  ;;  %v1077_v19 = vadd.f32 %v1076_v18, %v1075_v24 }
 0x28e   : > { %v2845_v13 = vpop.eup %1955  ;;  %v1261_v57 = vadd.f32 %v1260_v6, %v1198_v30  ;;  %v1204_v54 = vmul.f32 %v1989_v20, %v1153_v35  ;;  %v1216_v46 = vmul.f32 %v1990_v47, %v1177_v28  ;;  %v1022_v32 = vrot.slane %v1021_v58, 2 }
 0x28f   : > { %v1304_v31 = vrot.slane %v1303_v36, 2  ;;  %1963 = vrcp.f32 %v1031_v44  ;;  %v1078_v15 = vrot.slane %v1077_v19, 1  ;;  %v1116_v62 = vrot.slane %v2845_v13, 4 }
 0x290   : > { %v1348_v12 = vrot.slane %v1347_v41, 1  ;;  %v1398_v38 = vrot.slane %v1221_v53, 4  ;;  %v1357_v14 = vadd.f32 %v1356_v50, %v1214_v3  ;;  %v1023_v45 = vadd.f32 %v1022_v32, %v1021_v58 }
 0x291   : > { %v1958_v33 = vpop.eup %1957  ;;  %v2850_v42 = vadd.f32 %v1252_v39, %v1251_v59  ;;  %v2852_v34 = vadd.f32 %v1384_v63, %v1383_v5  ;;  %v1079_v30 = vadd.f32 %v1078_v15, %v1077_v19  ;;  %v1117_v7 = vadd.f32 %v2845_v13, %v1116_v62 }
 0x292   : > { %v2855_v6 = vpop.eup %1959  ;;  %v1262_v52 = vrot.slane %v1261_v57, 2  ;;  %v1296_v24 = vrot.slane %v1204_v54, 4  ;;  %v1368_v35 = vrot.slane %v1216_v46, 4  ;;  %v1024_v28 = vrot.slane %v1023_v45, 1 }
 0x293   : > { %v2857_v61 = vadd.f32 %v1304_v31, %v1303_v36  ;;  %1965 = vrcp.f32 %v1079_v30  ;;  %v1118_v26 = vrot.slane %v1117_v7, 2  ;;  %v1122_v3 = vrot.slane %v2855_v6, 4 }
 0x294   : > { %v1962_v59 = vpop.eup %1961  ;;  %v2860_v39 = vadd.f32 %v1348_v12, %v1347_v41  ;;  %v2862_v5 = vadd.f32 %v1398_v38, %v1221_v53  ;;  %v1358_v18 = vrot.slane %v1357_v14, 2  ;;  %v1025_v25 = vadd.f32 %v1024_v28, %v1023_v45  ;;  %v1991_v41 = vld [vmem:[%s2309_s6 + $0x38] sm:$0xff] }
 0x295   : > { %v1185_v50 = vmul.f32 %v1958_v33, %v2786_v56  ;;  %v1143_v58 = vmul.f32 %v1962_v59, %v2808_v51  ;;  %v1119_v63 = vadd.f32 %v1118_v26, %v1117_v7  ;;  %v1123_v36 = vadd.f32 %v2855_v6, %v1122_v3  ;;  %v1992_v51 = vld [vmem:[%s2309_s6 + $0xe0] sm:$0xff] }
 0x296   : > { %v1263_v44 = vadd.f32 %v1262_v52, %v1261_v57  ;;  %v1297_v19 = vadd.f32 %v1296_v24, %v1204_v54  ;;  %v1369_v20 = vadd.f32 %v1368_v35, %v1216_v46  ;;  %1967 = vrcp.f32 %v1025_v25  ;;  %v1993_v24 = vld [vmem:[%s2309_s6 + $0x78] sm:$0xff] }
 0x297   : > { %v1306_v47 = vrot.slane %v2857_v61, 1  ;;  %v1199_v32 = vmul.f32 %v1991_v41, %v1143_v58  ;;  %v1120_v53 = vrot.slane %v1119_v63, 1  ;;  %v1124_v31 = vrot.slane %v1123_v36, 2 }
 0x298   : > { %v1400_v15 = vrot.slane %v2862_v5, 2  ;;  %v2870_v62 = vadd.f32 %v1358_v18, %v1357_v14  ;;  %v1220_v12 = vmul.f32 %v1992_v51, %v1185_v50  ;;  %v1298_v38 = vrot.slane %v1297_v19, 2 }
 0x299   : > { %v1964_v56 = vpop.eup %1963  ;;  %v1266_v57 = vrot.slane %v1199_v32, 4  ;;  %v1121_v54 = vadd.f32 %v1120_v53, %v1119_v63  ;;  %v1125_v46 = vadd.f32 %v1124_v31, %v1123_v36  ;;  %v1370_v45 = vrot.slane %v1369_v20, 2  ;;  %v1994_v36 = vld [vmem:[%s2309_s6 + $0xb8] sm:$0xff] }
 0x29a   : > { %v1159_v33 = vmul.f32 %v1964_v56, %v2822_v37  ;;  %v1264_v30 = vrot.slane %v1263_v44, 1  ;;  %v1449_v14 = vsel %vm1448_vm0, %v2579_v48, %v2587_v60  ;;  %v1259_v28 = vadd.f32 %v1258_v8, %v2747_v0 }
 0x29b   : > { %v1267_v7 = vadd.f32 %v1266_v57, %v1199_v32  ;;  %1969 = vrcp.f32 %v1121_v54  ;;  %v1126_v52 = vrot.slane %v1125_v46, 1  ;;  %v1451_v26 = vsel %vm1450_vm1, %v2757_v27, %v1449_v14 }
 0x29c   : > { %v1207_v35 = vmul.f32 %v1993_v24, %v1159_v33  ;;  %v1392_v3 = vrot.slane %v1220_v12, 4  ;;  %v1371_v25 = vadd.f32 %v1370_v45, %v1369_v20  ;;  %v1265_v60 = vadd.f32 %v1264_v30, %v1263_v44 }
 0x29d   : > { %v1966_v37 = vpop.eup %1965  ;;  %v1127_v59 = vadd.f32 %v1126_v52, %v1125_v46  ;;  %v1268_v18 = vrot.slane %v1267_v7, 2  ;;  %v1299_v58 = vadd.f32 %v1298_v38, %v1297_v19  ;;  %v1453_v0 = vsel %vm1452_vm2, %v2672_v1, %v1451_v26  ;;  %v1995_v1 = vld [vmem:[%s2309_s6 + $0x70] sm:$0xff] }
 0x29e   : > { %v1314_v50 = vrot.slane %v1207_v35, 4  ;;  %v1175_v48 = vmul.f32 %v1966_v37, %v2830_v49  ;;  %v1455_v32 = vsel %vm1454_vm3, %v2850_v42, %v1453_v0  ;;  %v1393_v20 = vadd.f32 %v1392_v3, %v1220_v12 }
 0x29f   : > { %1971 = vrcp.f32 %v1127_v59  ;;  %v1269_v63 = vadd.f32 %v1268_v18, %v1267_v7  ;;  %v1372_v19 = vrot.slane %v1371_v25, 1  ;;  %v1360_v31 = vrot.slane %v2870_v62, 1 }
 0x2a0   : > { %v1968_v27 = vpop.eup %1967  ;;  %v1315_v8 = vadd.f32 %v1314_v50, %v1207_v35  ;;  %v1215_v41 = vmul.f32 %v1994_v36, %v1175_v48  ;;  %v1457_v57 = vsel %vm1456_vm4, %v1259_v28, %v1455_v32  ;;  %v1469_v42 = vsel %vm1448_vm0, %v2577_v9, %v2650_v2  ;;  %v1996_v28 = vld [vmem:[%s2309_s6 + $0xf0] sm:$0xff] }
 0x2a1   : > { %v1157_v49 = vmul.f32 %v1968_v27, %v2835_v55  ;;  %v1270_v44 = vrot.slane %v1269_v63, 1  ;;  %v1459_v55 = vsel %vm1458_vm5, %v1265_v60, %v1457_v57  ;;  %v1470_v46 = vsel %vm1450_vm1, %v2764_v17, %v1469_v42 }
 0x2a2   : > { %v1362_v53 = vrot.slane %v1215_v41, 4  ;;  %v1316_v12 = vrot.slane %v1315_v8, 2  ;;  %v1300_v45 = vrot.slane %v1299_v58, 1  ;;  %v1394_v33 = vrot.slane %v1393_v20, 2 }
 0x2a3   : > { %v1206_v56 = vmul.f32 %v1995_v1, %v1157_v49  ;;  %v1271_v51 = vadd.f32 %v1270_v44, %v1269_v63  ;;  %v1355_v9 = vadd.f32 %v1354_v43, %v2815_v22  ;;  %v1462_v2 = vsel %vm1448_vm0, %v2682_v16, %v2762_v11 }
 0x2a4   : > { %v1363_v54 = vadd.f32 %v1362_v53, %v1215_v41  ;;  %v1373_v17 = vadd.f32 %v1372_v19, %v1371_v25  ;;  %v1463_v35 = vsel %vm1450_vm1, %v2843_v4, %v1462_v2  ;;  %v1317_v37 = vadd.f32 %v1316_v12, %v1315_v8 }
 0x2a5   : > { %v1970_v38 = vpop.eup %1969  ;;  %v1308_v30 = vrot.slane %v1206_v56, 4  ;;  %v1461_v7 = vsel %vm1460_vm6, %v1271_v51, %v1459_v55  ;;  %v1301_v43 = vadd.f32 %v1300_v45, %v1299_v58  ;;  %v1395_v3 = vadd.f32 %v1394_v33, %v1393_v20 }
 0x2a6   : > { %v1364_v52 = vrot.slane %v1363_v54, 2  ;;  %v1189_v14 = vmul.f32 %v1970_v38, %v2845_v13  ;;  %1487 = vst [vmem:[%s2908_s28] sm:$0xff] %v1461_v7  ;;  %v1471_v13 = vsel %vm1452_vm2, %v2705_v23, %v1470_v46  ;;  %v1361_v18 = vadd.f32 %v1360_v31, %v2870_v62  ;;  %v1997_v62 = vld [vmem:[%s2309_s6 + $0xf8] sm:$0xff] }
 0x2a7   : > { %v1309_v24 = vadd.f32 %v1308_v30, %v1206_v56  ;;  %v1472_v16 = vsel %vm1454_vm3, %v2860_v39, %v1471_v13  ;;  %v1401_v4 = vadd.f32 %v1400_v15, %v2862_v5  ;;  %v1464_v60 = vsel %vm1452_vm2, %v2766_v29, %v1463_v35 }
 0x2a8   : > { %v1222_v26 = vmul.f32 %v1996_v28, %v1189_v14  ;;  %v1365_v22 = vadd.f32 %v1364_v52, %v1363_v54  ;;  %v1473_v39 = vsel %vm1456_vm4, %v1355_v9, %v1472_v16  ;;  %v1476_v58 = vsel %vm1448_vm0, %v2736_v21, %v1373_v17 }
 0x2a9   : > { %v1972_v11 = vpop.eup %1971  ;;  %v1310_v59 = vrot.slane %v1309_v24, 2  ;;  %v1318_v27 = vrot.slane %v1317_v37, 1  ;;  %v1396_v5 = vrot.slane %v1395_v3, 1  ;;  %v1474_v36 = vsel %vm1458_vm5, %v1361_v18, %v1473_v39 }
 0x2aa   : > { %v1404_v25 = vrot.slane %v1222_v26, 4  ;;  %v1191_v23 = vmul.f32 %v1972_v11, %v2855_v6  ;;  %v1366_v50 = vrot.slane %v1365_v22, 1  ;;  %v1465_v6 = vsel %vm1454_vm3, %v1301_v43, %v1464_v60 }
 0x2ab   : > { %v1311_v48 = vadd.f32 %v1310_v59, %v1309_v24  ;;  %v1307_v29 = vadd.f32 %v1306_v47, %v2857_v61  ;;  %v1391_v20 = vadd.f32 %v1390_v10, %v2806_v40  ;;  %v1477_v44 = vsel %vm1450_vm1, %v2852_v34, %v1476_v58 }
 0x2ac   : > { %v1405_v63 = vadd.f32 %v1404_v25, %v1222_v26  ;;  %v1223_v0 = vmul.f32 %v1997_v62, %v1191_v23  ;;  %v1367_v8 = vadd.f32 %v1366_v50, %v1365_v22  ;;  %v1319_v31 = vadd.f32 %v1318_v27, %v1317_v37 }
 0x2ad   : > { %v1312_v15 = vrot.slane %v1311_v48, 1  ;;  %v1466_v1 = vsel %vm1456_vm4, %v1307_v29, %v1465_v6  ;;  %v1402_v61 = vrot.slane %v1401_v4, 1  ;;  %v1397_v47 = vadd.f32 %v1396_v5, %v1395_v3 }
 0x2ae   : > { %v1406_v41 = vrot.slane %v1405_v63, 2  ;;  %v1410_v32 = vrot.slane %v1223_v0, 4  ;;  %v1475_v21 = vsel %vm1460_vm6, %v1367_v8, %v1474_v36  ;;  %v1478_v10 = vsel %vm1452_vm2, %v1391_v20, %v1477_v44 }
 0x2af   : > { %v1313_v49 = vadd.f32 %v1312_v15, %v1311_v48  ;;  %1489 = vst [vmem:[%s2908_s28 + $0x10] sm:$0xff] %v1475_v21  ;;  %v1479_v54 = vsel %vm1454_vm3, %v1397_v47, %v1478_v10  ;;  %v1403_v12 = vadd.f32 %v1402_v61, %v1401_v4 }
 0x2b0   : > { %v1407_v19 = vadd.f32 %v1406_v41, %v1405_v63  ;;  %v1411_v53 = vadd.f32 %v1410_v32, %v1223_v0 }
 0x2b1   : > { %v1467_v56 = vsel %vm1458_vm5, %v1313_v49, %v1466_v1  ;;  %v1480_v38 = vsel %vm1456_vm4, %v1403_v12, %v1479_v54 }
 0x2b2   : > { %v1412_v51 = vrot.slane %v1411_v53, 2  ;;  %v1408_v57 = vrot.slane %v1407_v19, 1  ;;  %v1468_v40 = vsel %vm1460_vm6, %v1319_v31, %v1467_v56 }
 0x2b3   : > { %1488 = vst [vmem:[%s2908_s28 + $0x8] sm:$0xff] %v1468_v40 }
 0x2b4   : > { %v1413_v34 = vadd.f32 %v1412_v51, %v1411_v53  ;;  %v1409_v42 = vadd.f32 %v1408_v57, %v1407_v19 }
 0x2b6   : > { %v1414_v55 = vrot.slane %v1413_v34, 1  ;;  %v1481_v45 = vsel %vm1458_vm5, %v1409_v42, %v1480_v38 }
 0x2b8   : > { %v1415_v46 = vadd.f32 %v1414_v55, %v1413_v34 }
 0x2ba   : > { %v1482_v33 = vsel %vm1460_vm6, %v1415_v46, %v1481_v45 }
 0x2bb   : > { %1490 = vst [vmem:[%s2908_s28 + $0x18] sm:$0xff] %v1482_v33 }
 0x2bc   : > { %2069 = shalt.err (!%p2066_p7)
}
 0x2bd   : > { %s2070_s6 = scalar_lea.hbm %s2953_s8, 512  ;;  %s2074_s12 = scalar_lea.hbm %s3006_s4, 1024 }
 0x2be   : > { %p2071_p9 = scmp.ne.s32.totalorder %s2953_s8, %s2070_s6  ;;  %p2075_p5 = scmp.lt.u32.totalorder %s2953_s8, %s3006_s4 }
 0x2bf   : > { %p2076_p11 = scmp.lt.u32.totalorder %s2074_s12, %s2070_s6  ;;  %p2078_p4 = scmp.lt.u32.totalorder %s2070_s6, %s2953_s8 }
 0x2c0   : > { %p2072_p1 = pnand %p2071_p9, %p2254_p12 }
 0x2c1   : > { %p2077_p2 = por %p2076_p11, %p2075_p5 }
 0x2c2   : > { %p2073_p0 = pneg %p2072_p1 }
 0x2c3   : > { %p2079_p6 = por %p2078_p4, %p2077_p2 }
 0x2c5   : > { %p2080_p8 = pnand %p2079_p6, %p2073_p0 }
 0x2c7   : > { %2083 = shalt.err (!%p2080_p8)
}
 0x2c8   : > { %s2133_s28 = smov 128   ;;  %s2134_s29 = smov 8  }
 0x2c9   : > { %1790 = dma.vmem_to_hbm [thread:$0]  (%p2254_p12), %s2955_s10, 512, %s2953_s8, %s1492_s19, %s2133_s28, %s2133_s28, %s2134_s29  }
 0x2ca PF: > { %s1520_s7 = sand.u32 1, %s2114_s15   ;;  %p3021_p10 = scmp.ne.s32.totalorder %s3011_s22, 0 }
 0x2cb   : > { %p3022_p13 = scmp.ge.s32.totalorder %s2126_s18, 2  ;;  %s1521_s26 = scalar_lea.sflag [#allocation4], %s1520_s7 }
 0x2cd   : > { %p1801_p3 = pnand %p3022_p13, %p3021_p10 }
 0x2cf   : > { %2109 = dma.done.wait (!%p1801_p3), %s1521_s26, 512  }
 0x2d0   : > { %2111 = vsyncadd (!%p1801_p3), %s1521_s26, 4294966784  ;;  %p18_p7 = scmp.ge.s32.totalorder %s2216_s27, 4   ;;  %s3023_s15 = smov %s2118_s16 }
 0x2d1   : > { %s3024_s16 = smov %s2122_s17  ;;  %s3025_s17 = smov %s2250_s24 }
 0x2d2   : > { %s3026_s18 = smov %s2216_s27  ;;  %20 = sbr.rel (!%p18_p7) target bundleno = 6 (0x6), region = 85 }
 0x2d9   :  { %1526 = vsyncpa [#allocation3], 1 }
 0x2da   :  { %1528 = vsyncpa [#allocation3 + $0x1], 1 }
 0x2db   :  { %1529 = vsyncpa [#allocation6], 1 }
 0x2dc   :  { %1530 = vsyncpa [#allocation4], 1 }
 0x2dd   :  { %1532 = vsyncpa [#allocation4 + $0x1], 1 }

</bundles_post_ra>
